<compile_context>
chip_gen: v5e
topology: v5e:2x2
jax: 0.10.0
libtpu: 0.0.40
codegen_flags: <defaults>
</compile_context>

<pallas_src>
import math
from typing import NamedTuple, Tuple

import jax
import jax.numpy as jnp
from jax.experimental import pallas as pl
from jax.experimental.pallas import tpu as pltpu


# ----------------------------- kernel --------------------------------------


def _make_mlp_kernel(layer_kinds, epilogue_dtype):
    """layer_kinds: tuple of 'dense' or 'skip' (skip => params are w_top, w_bot, b)."""
    n_layers = len(layer_kinds)

    def kernel(*refs):
        # refs = (x_ref, <params...>, out_ref)
        x_ref = refs[0]
        out_ref = refs[-1]
        params = refs[1:-1]

        # Cast to bf16 in-kernel (keeps the wrapper-side convert+pad pass off HBM).
        z = x_ref[...].astype(jnp.bfloat16)     # (tile_rows, pack*input_dim)
        y = z
        act = None
        idx = 0
        for li, kind in enumerate(layer_kinds):
            if kind == "skip":
                w_top = params[idx][...]
                w_bot = params[idx + 1][...]
                b = params[idx + 2][...]
                idx += 3
                # concat([y, z]) @ W  ==  y @ W_top + z @ W_bot (no lane concat)
                acc = jnp.dot(y, w_top, preferred_element_type=jnp.float32)
                acc = acc + jnp.dot(z, w_bot, preferred_element_type=jnp.float32)
            else:
                w = params[idx][...]
                b = params[idx + 1][...]
                idx += 2
                acc = jnp.dot(y, w, preferred_element_type=jnp.float32)
            # bias + ReLU epilogue (bf16 on v6e/v7x, f32 on v5e-and-older).
            act = jnp.maximum(acc.astype(epilogue_dtype) + b, 0.0)
            if li + 1 < n_layers:
                y = act.astype(jnp.bfloat16)     # MXU input for the next layer

        out_ref[...] = act.astype(out_ref.dtype)

    return kernel


# ----------------------- one-time parameter prep ----------------------------


class PreparedMLP(NamedTuple):
    layer_kinds: Tuple[str, ...]
    flat_params: Tuple[jax.Array, ...]
    input_dim: int
    hidden_dim: int
    hidden_p: int
    pack: int
    epilogue_dtype: object


def _device_kind():
    try:
        return jax.devices()[0].device_kind.lower()
    except Exception:
        return ""


def _default_epilogue_dtype():
    kind = _device_kind()
    # v5e and older have no bf16 VPU; keep the elementwise epilogue in f32 there.
    if any(v in kind for v in ("v2", "v3", "v4", "v5")):
        return jnp.float32
    return jnp.bfloat16


def _vmem_cap_bytes():
    kind = _device_kind()
    if "v7" in kind:
        return 48 << 20          # v7x: 64 MiB physical VMEM per TensorCore
    return 100 << 20             # v5e / v6e: 128 MiB physical


def _choose_pack(input_dim, hidden_dim):
    """Pick (pack, hidden_p) so pack*hidden_p is a multiple of 128 (unmasked vst)."""
    if hidden_dim >= 128:
        hidden_p = pl.cdiv(hidden_dim, 128) * 128
        return 1, hidden_p
    hidden_p = pl.next_power_of_2(hidden_dim)    # divides 128
    pack = 128 // hidden_p
    # Try to also make the packed input row a full lane multiple (free: only the
    # massively idle MXU sees the extra zero blocks). e.g. in=32, h=64 -> pack=4.
    p = pack
    while p * hidden_p <= 256 and p * input_dim <= 512:
        if (p * input_dim) % 128 == 0:
            return p, hidden_p
        p *= 2
    # TODO(synk): column-pad x when no pack makes pack*input_dim lane-dense
    # (load-side only; stores are already lane-dense via hidden_p padding).
    return pack, hidden_p


def _pad_to(w, rows, cols):
    r, c = w.shape
    if r == rows and c == cols:
        return w
    return jnp.pad(w, ((0, rows - r), (0, cols - c)))


def _block_diag(w, pack):
    """Replicate w on the diagonal of a (pack*din, pack*dout) matrix."""
    if pack == 1:
        return w
    din, dout = w.shape
    out = jnp.zeros((pack * din, pack * dout), w.dtype)
    for p in range(pack):
        out = out.at[p * din:(p + 1) * din, p * dout:(p + 1) * dout].set(w)
    return out


def prepare_mlp_params(weights, biases, input_skips, input_dim, *, epilogue_dtype=None):
    """One-time preprocessing: bf16 block-diagonal weights, padded/tiled biases."""
    skips = set(int(s) for s in input_skips)
    if 0 in skips:
        raise ValueError("input_skips containing layer 0 is not supported (the "
                         "original module would also fail: layer 0 expects input_dim).")
    hidden_dim = int(weights[-1].shape[1])
    pack, hidden_p = _choose_pack(input_dim, hidden_dim)
    if epilogue_dtype is None:
        epilogue_dtype = _default_epilogue_dtype()

    layer_kinds = []
    flat_params = []
    for li, (w, b) in enumerate(zip(weights, biases)):
        w = jnp.asarray(w)
        b = jnp.asarray(b).reshape(1, -1)
        b_p = jnp.tile(_pad_to(b.astype(epilogue_dtype), 1, hidden_p), (1, pack))
        if li in skips:
            dim_y = w.shape[0] - input_dim   # width of y before the concat
            assert dim_y == hidden_dim, (
                "skip layers require skip_dim == input_dim (z = x in the module)")
            w_top = _block_diag(_pad_to(w[:dim_y].astype(jnp.bfloat16),
                                        hidden_p, hidden_p), pack)
            w_bot = _block_diag(_pad_to(w[dim_y:].astype(jnp.bfloat16),
                                        input_dim, hidden_p), pack)
            layer_kinds.append("skip")
            flat_params += [w_top, w_bot, b_p]
        else:
            din = input_dim if li == 0 else hidden_p
            w_p = _block_diag(_pad_to(w.astype(jnp.bfloat16), din, hidden_p), pack)
            layer_kinds.append("dense")
            flat_params += [w_p, b_p]

    return PreparedMLP(tuple(layer_kinds), tuple(flat_params), int(input_dim),
                       hidden_dim, int(hidden_p), int(pack), epilogue_dtype)


# ----------------------------- tiling heuristics -----------------------------


def _vmem_need(tile_rows, pack, input_dim, hidden_p, x_isz, out_isz, param_bytes):
    in_tile = tile_rows * pack * input_dim * x_isz
    out_tile = tile_rows * pack * hidden_p * out_isz
    # in-kernel intermediates: z (bf16) + y (bf16) + f32 acc + epilogue act
    inter = tile_rows * pack * (input_dim * 2 + hidden_p * (4 + 4 + 2))
    return 2 * (in_tile + out_tile) + inter + 2 * param_bytes + (4 << 20)


def _pick_tile_m(n_log_rows, pack, input_dim, hidden_p, x_isz, out_isz,
                 param_bytes, vmem_cap):
    row8 = 8 * pack
    io_row = input_dim * x_isz + hidden_p * out_isz
    tile_m = pl.cdiv(3 << 20, io_row)              # ~3 MiB of in+out per grid step
    tile_m = min(max(tile_m, row8), 8192)
    # Megacore-aware: keep >=4 (>=2) grid steps whenever the row count permits.
    if n_log_rows >= 4 * row8:
        tile_m = min(tile_m, max(row8, (n_log_rows // 4) // row8 * row8))
    elif n_log_rows >= 2 * row8:
        tile_m = min(tile_m, max(row8, (n_log_rows // 2) // row8 * row8))
    tile_m = max(row8, (tile_m // row8) * row8)
    # Shrink until the declared VMEM budget (tiles + intermediates + params) fits.
    while tile_m > row8 and _vmem_need(tile_m // pack, pack, input_dim, hidden_p,
                                       x_isz, out_isz, param_bytes) > vmem_cap:
        tile_m = max(row8, ((tile_m // 2) // row8) * row8)
    return tile_m


# ----------------------------- forward wrapper -------------------------------


def mlp_with_input_skips(x, prepared: PreparedMLP, *, tile_m=None,
                         out_dtype=jnp.bfloat16):
    """Forward pass of MLPWithInputSkips2. x: (..., input_dim) -> (..., hidden_dim)."""
    orig_shape = x.shape
    input_dim = prepared.input_dim
    hidden_dim = prepared.hidden_dim
    hidden_p = prepared.hidden_p
    pack = prepared.pack
    row8 = 8 * pack

    x_flat = x.reshape(-1, input_dim)
    n_rows = x_flat.shape[0]

    # Pad only to a multiple of `pack` (>= 8*pack); ragged last block is masked
    # by the cdiv grid, and padded garbage rows never reach the stored output.
    n_pad = max(pl.cdiv(n_rows, pack) * pack, row8)
    if n_pad != n_rows:
        x_flat = jnp.pad(x_flat, ((0, n_pad - n_rows), (0, 0)))
    n_packed = n_pad // pack
    # Row-major reshape -> lane-packed rows; free (metadata only) when no pad.
    x_packed = x_flat.reshape(n_packed, pack * input_dim)

    param_bytes = sum(int(p.size) * p.dtype.itemsize for p in prepared.flat_params)
    x_isz = x_packed.dtype.itemsize
    out_isz = jnp.dtype(out_dtype).itemsize
    vmem_cap = _vmem_cap_bytes()

    if tile_m is None:
        tile_m = _pick_tile_m(n_pad, pack, input_dim, hidden_p,
                              x_isz, out_isz, param_bytes, vmem_cap)
    tile_m = max(row8, (int(tile_m) // row8) * row8)   # packed rows sublane-aligned
    tile_rows = tile_m // pack

    in_w = pack * input_dim
    out_w = pack * hidden_p

    in_specs = [pl.BlockSpec((tile_rows, in_w), lambda i: (i, 0))]
    for p in prepared.flat_params:
        in_specs.append(pl.BlockSpec(p.shape, lambda i: (0, 0)))   # grid-invariant
    out_specs = pl.BlockSpec((tile_rows, out_w), lambda i: (i, 0))

    vmem_limit = int(min(vmem_cap, max(32 << 20,
                                       _vmem_need(tile_rows, pack, input_dim, hidden_p,
                                                  x_isz, out_isz, param_bytes))))

    kernel = _make_mlp_kernel(prepared.layer_kinds, prepared.epilogue_dtype)

    y_packed = pl.pallas_call(
        kernel,
        out_shape=jax.ShapeDtypeStruct((n_packed, out_w), out_dtype),
        grid_spec=pltpu.PrefetchScalarGridSpec(
            num_scalar_prefetch=0,
            grid=(pl.cdiv(n_packed, tile_rows),),
            in_specs=in_specs,
            out_specs=out_specs,
        ),
        compiler_params=pltpu.CompilerParams(
            dimension_semantics=("parallel",),
            vmem_limit_bytes=vmem_limit,
        ),
    )(x_packed, *prepared.flat_params)

    y = y_packed.reshape(n_pad, hidden_p)[:n_rows, :hidden_dim]
    return y.reshape(*orig_shape[:-1], hidden_dim)


# ----------------------- parameter initialization ---------------------------


def init_params(key, n_layers, input_dim, skip_dim, hidden_dim, input_skips):
    """Deterministic Xavier-uniform weights + PyTorch-default uniform biases (f32)."""
    weights, biases = [], []
    skips = set(input_skips)
    for li in range(n_layers):
        if li == 0:
            dimin, dimout = input_dim, hidden_dim
        elif li in skips:
            dimin, dimout = hidden_dim + skip_dim, hidden_dim
        else:
            dimin, dimout = hidden_dim, hidden_dim
        key, kw, kb = jax.random.split(key, 3)
        bound_w = math.sqrt(6.0 / (dimin + dimout))          # xavier_uniform_
        w = jax.random.uniform(kw, (dimin, dimout), jnp.float32, -bound_w, bound_w)
        bound_b = 1.0 / math.sqrt(dimin)                     # nn.Linear default bias
        b = jax.random.uniform(kb, (1, dimout), jnp.float32, -bound_b, bound_b)
        weights.append(w)
        biases.append(b)
    return weights, biases


def reference_forward(x_flat, weights, biases, input_skips, *,
                      matmul_dtype=None, epilogue_dtype=jnp.float32, out_dtype=None):
    """Pure-JAX reference. matmul_dtype=None -> f32 math (module semantics);
    matmul_dtype=bf16 -> mirrors the kernel's mixed-precision path."""
    skips = set(input_skips)
    if matmul_dtype is None:
        y = x_flat
        z = x_flat
        for li, (w, b) in enumerate(zip(weights, biases)):
            if li in skips:
                y = jnp.concatenate([y, z], axis=-1)
            y = jnp.maximum(y @ w + b.reshape(1, -1), 0.0)
        return y
    z = x_flat.astype(matmul_dtype)
    y = z
    n_layers = len(weights)
    for li, (w, b) in enumerate(zip(weights, biases)):
        if li in skips:
            y = jnp.concatenate([y, z], axis=-1)
        acc = jnp.dot(y, w.astype(matmul_dtype), preferred_element_type=jnp.float32)
        act = jnp.maximum(acc.astype(epilogue_dtype)
                          + b.reshape(1, -1).astype(epilogue_dtype), 0.0)
        y = act.astype(matmul_dtype) if li + 1 < n_layers else act
    return y.astype(out_dtype) if out_dtype is not None else y


# --------------------------------- main -------------------------------------

if __name__ == "__main__":
    # Small config consistent with the module (skip_dim == input_dim, since z = x).
    n_layers = 4
    input_dim = 32
    skip_dim = 32
    hidden_dim = 64
    input_skips = (2,)

    batch, n_points = 2, 500   # 1000 rows -> ragged last grid block (exercises masking)
    key = jax.random.PRNGKey(0)
    key, kx = jax.random.split(key)
    x = jax.random.normal(kx, (batch, n_points, input_dim), jnp.float32)

    weights, biases = init_params(
        key, n_layers, input_dim, skip_dim, hidden_dim, input_skips
    )

    # One-time parameter preprocessing (hoisted out of the per-call path).
    prepared = prepare_mlp_params(weights, biases, input_skips, input_dim)

    y = mlp_with_input_skips(x, prepared)          # bf16 output by default
    jax.block_until_ready(y)

    # Correctness: tight vs a mixed-precision mirror of the kernel path, loose vs
    # the pure-f32 module reference.
    x_flat = x.reshape(-1, input_dim)
    y_flat = y.reshape(-1, hidden_dim).astype(jnp.float32)
    y_ref_mixed = reference_forward(
        x_flat, weights, biases, input_skips,
        matmul_dtype=jnp.bfloat16, epilogue_dtype=prepared.epilogue_dtype,
        out_dtype=jnp.bfloat16).astype(jnp.float32)
    y_ref_f32 = reference_forward(x_flat, weights, biases, input_skips)

    assert jnp.allclose(y_flat, y_ref_mixed, atol=2e-2, rtol=2e-2), \
        "mismatch vs mixed-precision reference"
    assert jnp.allclose(y_flat, y_ref_f32, atol=1e-1, rtol=1e-1), \
        "mismatch vs f32 module reference"

    print("KERNEL_OK")
</pallas_src>

<mosaic_0001>
module attributes {stable_mosaic.version = 11 : i64} {
  func.func @kernel(%arg0: i32, %arg1: memref<56x128xf32, #tpu.memory_space<vmem>>, %arg2: memref<128x256xbf16, #tpu.memory_space<vmem>>, %arg3: memref<1x256xbf16, #tpu.memory_space<vmem>>, %arg4: memref<256x256xbf16, #tpu.memory_space<vmem>>, %arg5: memref<1x256xbf16, #tpu.memory_space<vmem>>, %arg6: memref<256x256xbf16, #tpu.memory_space<vmem>>, %arg7: memref<128x256xbf16, #tpu.memory_space<vmem>>, %arg8: memref<1x256xbf16, #tpu.memory_space<vmem>>, %arg9: memref<256x256xbf16, #tpu.memory_space<vmem>>, %arg10: memref<1x256xbf16, #tpu.memory_space<vmem>>, %arg11: memref<56x256xbf16, #tpu.memory_space<vmem>>) attributes {dimension_semantics = [#tpu.dimension_semantics<parallel>], iteration_bounds = array<i64: 5>, scalar_prefetch = 0 : i64, scratch_operands = 0 : i64, tpu.core_type = #tpu.core_type<tc>, window_params = [{transform_indices = @transform_0, window_bounds = array<i64: 56, 128>}, {pipeline_mode = #tpu.pipeline_mode<synchronous>, transform_indices = @transform_1, window_bounds = array<i64: 128, 256>}, {pipeline_mode = #tpu.pipeline_mode<synchronous>, transform_indices = @transform_2, window_bounds = array<i64: 1, 256>}, {pipeline_mode = #tpu.pipeline_mode<synchronous>, transform_indices = @transform_3, window_bounds = array<i64: 256, 256>}, {pipeline_mode = #tpu.pipeline_mode<synchronous>, transform_indices = @transform_4, window_bounds = array<i64: 1, 256>}, {pipeline_mode = #tpu.pipeline_mode<synchronous>, transform_indices = @transform_5, window_bounds = array<i64: 256, 256>}, {pipeline_mode = #tpu.pipeline_mode<synchronous>, transform_indices = @transform_6, window_bounds = array<i64: 128, 256>}, {pipeline_mode = #tpu.pipeline_mode<synchronous>, transform_indices = @transform_7, window_bounds = array<i64: 1, 256>}, {pipeline_mode = #tpu.pipeline_mode<synchronous>, transform_indices = @transform_8, window_bounds = array<i64: 256, 256>}, {pipeline_mode = #tpu.pipeline_mode<synchronous>, transform_indices = @transform_9, window_bounds = array<i64: 1, 256>}, {transform_indices = @transform_10, window_bounds = array<i64: 56, 256>}]} {
    %c0 = arith.constant 0 : index
    %c0_0 = arith.constant 0 : index
    %0 = vector.load %arg1[%c0, %c0_0] : memref<56x128xf32, #tpu.memory_space<vmem>>, vector<56x128xf32>
    %1 = arith.truncf %0 : vector<56x128xf32> to vector<56x128xbf16>
    %c0_1 = arith.constant 0 : index
    %c0_2 = arith.constant 0 : index
    %2 = vector.load %arg2[%c0_1, %c0_2] : memref<128x256xbf16, #tpu.memory_space<vmem>>, vector<128x256xbf16>
    %c0_3 = arith.constant 0 : index
    %c0_4 = arith.constant 0 : index
    %3 = vector.load %arg3[%c0_3, %c0_4] : memref<1x256xbf16, #tpu.memory_space<vmem>>, vector<1x256xbf16>
    %cst = arith.constant dense<0.000000e+00> : vector<56x256xf32>
    %4 = tpu.matmul %1, %2, %cst {dimension_numbers = #tpu.dot_dimension_numbers<[1], [0], [0], [1], [0, 0, 1, 1], [], []>} : vector<56x128xbf16>, vector<128x256xbf16>, vector<56x256xf32> -> vector<56x256xf32>
    %5 = arith.truncf %4 : vector<56x256xf32> to vector<56x256xbf16>
    %6 = vector.broadcast %3 : vector<1x256xbf16> to vector<56x256xbf16>
    %7 = arith.addf %5, %6 : vector<56x256xbf16>
    %cst_5 = arith.constant 0.000000e+00 : bf16
    %8 = vector.broadcast %cst_5 : bf16 to vector<56x256xbf16>
    %9 = arith.maximumf %7, %8 : vector<56x256xbf16>
    %c0_6 = arith.constant 0 : index
    %c0_7 = arith.constant 0 : index
    %10 = vector.load %arg4[%c0_6, %c0_7] : memref<256x256xbf16, #tpu.memory_space<vmem>>, vector<256x256xbf16>
    %c0_8 = arith.constant 0 : index
    %c0_9 = arith.constant 0 : index
    %11 = vector.load %arg5[%c0_8, %c0_9] : memref<1x256xbf16, #tpu.memory_space<vmem>>, vector<1x256xbf16>
    %cst_10 = arith.constant dense<0.000000e+00> : vector<56x256xf32>
    %12 = tpu.matmul %9, %10, %cst_10 {dimension_numbers = #tpu.dot_dimension_numbers<[1], [0], [0], [1], [0, 0, 1, 1], [], []>} : vector<56x256xbf16>, vector<256x256xbf16>, vector<56x256xf32> -> vector<56x256xf32>
    %13 = arith.truncf %12 : vector<56x256xf32> to vector<56x256xbf16>
    %14 = vector.broadcast %11 : vector<1x256xbf16> to vector<56x256xbf16>
    %15 = arith.addf %13, %14 : vector<56x256xbf16>
    %cst_11 = arith.constant 0.000000e+00 : bf16
    %16 = vector.broadcast %cst_11 : bf16 to vector<56x256xbf16>
    %17 = arith.maximumf %15, %16 : vector<56x256xbf16>
    %c0_12 = arith.constant 0 : index
    %c0_13 = arith.constant 0 : index
    %18 = vector.load %arg6[%c0_12, %c0_13] : memref<256x256xbf16, #tpu.memory_space<vmem>>, vector<256x256xbf16>
    %c0_14 = arith.constant 0 : index
    %c0_15 = arith.constant 0 : index
    %19 = vector.load %arg7[%c0_14, %c0_15] : memref<128x256xbf16, #tpu.memory_space<vmem>>, vector<128x256xbf16>
    %c0_16 = arith.constant 0 : index
    %c0_17 = arith.constant 0 : index
    %20 = vector.load %arg8[%c0_16, %c0_17] : memref<1x256xbf16, #tpu.memory_space<vmem>>, vector<1x256xbf16>
    %cst_18 = arith.constant dense<0.000000e+00> : vector<56x256xf32>
    %21 = tpu.matmul %17, %18, %cst_18 {dimension_numbers = #tpu.dot_dimension_numbers<[1], [0], [0], [1], [0, 0, 1, 1], [], []>} : vector<56x256xbf16>, vector<256x256xbf16>, vector<56x256xf32> -> vector<56x256xf32>
    %cst_19 = arith.constant dense<0.000000e+00> : vector<56x256xf32>
    %22 = tpu.matmul %1, %19, %cst_19 {dimension_numbers = #tpu.dot_dimension_numbers<[1], [0], [0], [1], [0, 0, 1, 1], [], []>} : vector<56x128xbf16>, vector<128x256xbf16>, vector<56x256xf32> -> vector<56x256xf32>
    %23 = arith.addf %21, %22 : vector<56x256xf32>
    %24 = arith.truncf %23 : vector<56x256xf32> to vector<56x256xbf16>
    %25 = vector.broadcast %20 : vector<1x256xbf16> to vector<56x256xbf16>
    %26 = arith.addf %24, %25 : vector<56x256xbf16>
    %cst_20 = arith.constant 0.000000e+00 : bf16
    %27 = vector.broadcast %cst_20 : bf16 to vector<56x256xbf16>
    %28 = arith.maximumf %26, %27 : vector<56x256xbf16>
    %c0_21 = arith.constant 0 : index
    %c0_22 = arith.constant 0 : index
    %29 = vector.load %arg9[%c0_21, %c0_22] : memref<256x256xbf16, #tpu.memory_space<vmem>>, vector<256x256xbf16>
    %c0_23 = arith.constant 0 : index
    %c0_24 = arith.constant 0 : index
    %30 = vector.load %arg10[%c0_23, %c0_24] : memref<1x256xbf16, #tpu.memory_space<vmem>>, vector<1x256xbf16>
    %cst_25 = arith.constant dense<0.000000e+00> : vector<56x256xf32>
    %31 = tpu.matmul %28, %29, %cst_25 {dimension_numbers = #tpu.dot_dimension_numbers<[1], [0], [0], [1], [0, 0, 1, 1], [], []>} : vector<56x256xbf16>, vector<256x256xbf16>, vector<56x256xf32> -> vector<56x256xf32>
    %32 = arith.truncf %31 : vector<56x256xf32> to vector<56x256xbf16>
    %33 = vector.broadcast %30 : vector<1x256xbf16> to vector<56x256xbf16>
    %34 = arith.addf %32, %33 : vector<56x256xbf16>
    %cst_26 = arith.constant 0.000000e+00 : bf16
    %35 = vector.broadcast %cst_26 : bf16 to vector<56x256xbf16>
    %36 = arith.maximumf %34, %35 : vector<56x256xbf16>
    %c0_27 = arith.constant 0 : index
    %c0_28 = arith.constant 0 : index
    %37 = vector.load %arg11[%c0_27, %c0_28] : memref<56x256xbf16, #tpu.memory_space<vmem>>, vector<56x256xbf16>
    tpu.vector_store %arg11[%c0_27, %c0_28], %36 {strides = array<i32>} : memref<56x256xbf16, #tpu.memory_space<vmem>>, vector<56x256xbf16>,
    return
  }
  func.func @transform_0(%arg0: i32) -> (i32, i32) {
    %c0_i32 = arith.constant 0 : i32
    %c0_i32_0 = arith.constant 0 : i32
    return %arg0, %c0_i32 : i32, i32
  }
  func.func @transform_1(%arg0: i32) -> (i32, i32) {
    %c0_i32 = arith.constant 0 : i32
    %c0_i32_0 = arith.constant 0 : i32
    %c0_i32_1 = arith.constant 0 : i32
    return %c0_i32, %c0_i32_0 : i32, i32
  }
  func.func @transform_2(%arg0: i32) -> (i32, i32) {
    %c0_i32 = arith.constant 0 : i32
    %c0_i32_0 = arith.constant 0 : i32
    %c0_i32_1 = arith.constant 0 : i32
    return %c0_i32, %c0_i32_0 : i32, i32
  }
  func.func @transform_3(%arg0: i32) -> (i32, i32) {
    %c0_i32 = arith.constant 0 : i32
    %c0_i32_0 = arith.constant 0 : i32
    %c0_i32_1 = arith.constant 0 : i32
    return %c0_i32, %c0_i32_0 : i32, i32
  }
  func.func @transform_4(%arg0: i32) -> (i32, i32) {
    %c0_i32 = arith.constant 0 : i32
    %c0_i32_0 = arith.constant 0 : i32
    %c0_i32_1 = arith.constant 0 : i32
    return %c0_i32, %c0_i32_0 : i32, i32
  }
  func.func @transform_5(%arg0: i32) -> (i32, i32) {
    %c0_i32 = arith.constant 0 : i32
    %c0_i32_0 = arith.constant 0 : i32
    %c0_i32_1 = arith.constant 0 : i32
    return %c0_i32, %c0_i32_0 : i32, i32
  }
  func.func @transform_6(%arg0: i32) -> (i32, i32) {
    %c0_i32 = arith.constant 0 : i32
    %c0_i32_0 = arith.constant 0 : i32
    %c0_i32_1 = arith.constant 0 : i32
    return %c0_i32, %c0_i32_0 : i32, i32
  }
  func.func @transform_7(%arg0: i32) -> (i32, i32) {
    %c0_i32 = arith.constant 0 : i32
    %c0_i32_0 = arith.constant 0 : i32
    %c0_i32_1 = arith.constant 0 : i32
    return %c0_i32, %c0_i32_0 : i32, i32
  }
  func.func @transform_8(%arg0: i32) -> (i32, i32) {
    %c0_i32 = arith.constant 0 : i32
    %c0_i32_0 = arith.constant 0 : i32
    %c0_i32_1 = arith.constant 0 : i32
    return %c0_i32, %c0_i32_0 : i32, i32
  }
  func.func @transform_9(%arg0: i32) -> (i32, i32) {
    %c0_i32 = arith.constant 0 : i32
    %c0_i32_0 = arith.constant 0 : i32
    %c0_i32_1 = arith.constant 0 : i32
    return %c0_i32, %c0_i32_0 : i32, i32
  }
  func.func @transform_10(%arg0: i32) -> (i32, i32) {
    %c0_i32 = arith.constant 0 : i32
    %c0_i32_0 = arith.constant 0 : i32
    return %arg0, %c0_i32 : i32, i32
  }
}

</mosaic_0001>

<bundles_post_ra>
// kernel: tpu_custom_call.1
= control target key start
LH: loop header
LB: loop body
LE: loop exit
PB: predicated region body
PF: predicated region fallthrough
CT: control target
= control target key end

     0   :  { %s3828_s0 = inlined_call_operand.hbm [shape: f32[250,128], index: 0, kind: input, shape index: {}]   ;;  %s3829_s1 = inlined_call_operand.hbm [shape: bf16[128,256], index: 1, kind: input, shape index: {}]   ;;  %s3830_s2 = inlined_call_operand.hbm [shape: bf16[1,256], index: 2, kind: input, shape index: {}]   ;;  %s3831_s3 = inlined_call_operand.hbm [shape: bf16[256,256], index: 3, kind: input, shape index: {}]   ;;  %s3832_s4 = inlined_call_operand.vmem [shape: bf16[1,256], index: 4, kind: input, shape index: {}]   ;;  %s3833_s5 = inlined_call_operand.hbm [shape: bf16[256,256], index: 5, kind: input, shape index: {}]   ;;  %s3834_s6 = inlined_call_operand.hbm [shape: bf16[128,256], index: 6, kind: input, shape index: {}]   ;;  %s3835_s7 = inlined_call_operand.vmem [shape: bf16[1,256], index: 7, kind: input, shape index: {}]   ;;  %s3836_s8 = inlined_call_operand.hbm [shape: bf16[256,256], index: 8, kind: input, shape index: {}]   ;;  %s3837_s9 = inlined_call_operand.vmem [shape: bf16[1,256], index: 9, kind: input, shape index: {}]   ;;  %s3838_s10 = inlined_call_operand.hbm [shape: bf16[250,256], index: 10, kind: output, shape index: {}]  }
   0x1   :  { %3845 = sst [smem:[#allocation24_spill]] %s3829_s1 }
   0x2   :  { %3846 = sst [smem:[#allocation25_spill]] %s3830_s2 }
   0x3   :  { %3847 = sst [smem:[#allocation26_spill]] %s3831_s3 }
   0x4   :  { %3848 = sst [smem:[#allocation27_spill]] %s3838_s10 }
   0x5   :  { %15 = vsyncpa [#allocation3], 0 }
   0x6   :  { %17 = vsyncpa [#allocation3 + $0x1], 0 }
   0x7   :  { %18 = vsyncpa [#allocation6], 0 }
   0x8   :  { %19 = vsyncpa [#allocation9], 0 }
   0x9   :  { %20 = vsyncpa [#allocation12], 0 }
   0xa   :  { %21 = vsyncpa [#allocation4], 0 }
   0xb   :  { %23 = vsyncpa [#allocation4 + $0x1], 0  ;;  %s3409_s13 = smov 0   ;;  %s3411_s14 = smov 0  }
   0xc   :  { %s3413_s15 = smov 0   ;;  %s3415_s16 = smov 0  }
   0xd LB: > { %3849 = sst [smem:[#allocation20_spill]] %s3326_s13  ;;  %s3430_s17 = sadd.s32 4294967295, %s3338_s16   ;;  %s3338_s16 = sphi %s3415_s16, %s3874_s16   ;;  %s3334_s15 = sphi %s3413_s15, %s3878_s15   ;;  %s3330_s14 = sphi %s3411_s14, %s3877_s14   ;;  %s3326_s13 = sphi %s3409_s13, %s3876_s13  }
   0xe   : > { %s2247_s18 = sadd.s32 4294967294, %s3338_s16   ;;  %s3434_s19 = sadd.s32 1, %s3338_s16  }
   0xf   : > { %3850 = sst [smem:[#allocation21_spill]] %s3434_s19  ;;  %s36_s20 = sadd.s32 1, %s3334_s15 }
  0x10   : > { %s33_s21 = ssub.s32 %s3338_s16, %s3434_s19  ;;  %p43_p0 = scmp.ne.s32.totalorder %s3334_s15, %s3330_s14 }
  0x11   : > { %p34_p1 = scmp.eq.s32.totalorder %s33_s21, 0  ;;  %p44_p2 = scmp.eq.s32.totalorder %s3338_s16, 0 }
  0x12   : > { %p49_p3 = scmp.ne.s32.totalorder %s3330_s14, %s3326_s13  ;;  %p3844_p4 = scmp.eq.s32.totalorder %s3430_s17, 0 }
  0x13   : > { %s3446_s22 = scalar_select %p34_p1, %s3334_s15, %s36_s20  }
  0x14   : > { %p3448_p5 = por %p44_p2, %p43_p0  ;;  %p3454_p6 = por %p3844_p4, %p49_p3 }
  0x15   : > { %3851 = sst [smem:[#allocation22_spill]] %s3446_s22  ;;  %p262_p7 = scmp.eq.s32.totalorder %s3430_s17, 4 }
  0x16   : > { %p268_p8 = scmp.eq.s32.totalorder %s2247_s18, 4  ;;  %p2248_p9 = scmp.ge.s32.totalorder %s3338_s16, 1 }
  0x17   : > { %p275_p10 = scmp.lt.s32.totalorder %s3338_s16, 6  ;;  %p3461_p11 = por %p262_p7, %p43_p0 }
  0x18   : > { %p3465_p12 = por %p268_p8, %p49_p3  ;;  %s3858_s1 = sld [smem:[#allocation24_spill]] }
  0x19   : > { %p3469_p13 = pnand %p2248_p9, %p275_p10  ;;  %s3340_s11 = smov [#allocation5]  }
  0x1a   : > { %s3855_s26 = scalar_select %p3465_p12, 1, 0 }
  0x1b   : > { %p2950_p1 = pneg %p3469_p13  ;;  %s288_s12 = sshll.u32 %s3340_s11, 4  ;;  %s289_s12 = int_to_ptr.vmem [resolvable:$true] %s288_s12 }
  0x1c   : > { %3856 = sst [smem:[#allocation23_spill]] %s3855_s26  ;;  %s3341_s28 = smov 128  }
  0x1d   : > { %p3480_p0 = pnand %p2950_p1, %p3844_p4  ;;  %s3860_s3 = sld [smem:[#allocation26_spill]] }
  0x1e   : > { %s286_s30 = sshll.u32 %s3858_s1, 4  ;;  %s3342_s29 = smov 8   ;;  %s287_s30 = int_to_ptr.hbm [resolvable:$true] %s286_s30 }
  0x1f   : > { %2953 = dma.hbm_to_vmem [thread:$0]  (!%p3480_p0), %s287_s30, 2048, %s289_s12, [#allocation6], %s3341_s28, %s3341_s28, %s3342_s29  }
  0x20   : > { %s343_s19 = sshll.u32 %s3834_s6, 4  ;;  %s3343_s26 = smov [#allocation8]   ;;  %s344_s19 = int_to_ptr.hbm [resolvable:$true] %s343_s19 }
  0x21   : > { %s314_s13 = sshll.u32 %s3343_s26, 4  ;;  %s3344_s20 = smov [#allocation11]   ;;  %s315_s13 = int_to_ptr.vmem [resolvable:$true] %s314_s13 }
  0x22   : > { %s345_s21 = sshll.u32 %s3344_s20, 4  ;;  %s3861_s2 = sld [smem:[#allocation25_spill]]  ;;  %s346_s21 = int_to_ptr.vmem [resolvable:$true] %s345_s21 }
  0x23   : > { %s312_s22 = sshll.u32 %s3860_s3, 4  ;;  %s329_s12 = sshll.u32 %s3833_s5, 4  ;;  %s313_s22 = int_to_ptr.hbm [resolvable:$true] %s312_s22  ;;  %s330_s12 = int_to_ptr.hbm [resolvable:$true] %s329_s12 }
  0x24   : > { %2959 = dma.hbm_to_vmem [thread:$0]  (!%p3480_p0), %s313_s22, 4096, %s315_s13, [#allocation9], %s3341_s28, %s3341_s28, %s3342_s29  }
  0x25   : > { %2965 = dma.hbm_to_vmem [thread:$0]  (!%p3480_p0), %s344_s19, 2048, %s346_s21, [#allocation12], %s3341_s28, %s3341_s28, %s3342_s29  }
  0x26   : > { %s3345_s13 = smov [#allocation7]   ;;  %s3346_s3 = smov [#allocation10]  }
  0x27   : > { %s303_s22 = sshll.u32 %s3345_s13, 4  ;;  %s331_s10 = sshll.u32 %s3346_s3, 4  ;;  %s304_s22 = int_to_ptr.vmem [resolvable:$true] %s303_s22  ;;  %s332_s10 = int_to_ptr.vmem [resolvable:$true] %s331_s10 }
  0x28   : > { %s301_s30 = sshll.u32 %s3861_s2, 4  ;;  %s360_s2 = sshll.u32 %s3836_s8, 4  ;;  %s302_s30 = int_to_ptr.hbm [resolvable:$true] %s301_s30  ;;  %s361_s2 = int_to_ptr.hbm [resolvable:$true] %s360_s2 }
  0x29   : > { %2956 = dma.hbm_to_vmem [thread:$0]  (!%p3480_p0), %s302_s30, 32, %s304_s22, [#allocation6]  }
  0x2a   : > { %2962 = dma.hbm_to_vmem [thread:$0]  (!%p3480_p0), %s330_s12, 4096, %s332_s10, [#allocation9], %s3341_s28, %s3341_s28, %s3342_s29  }
  0x2b   : > { %s3347_s19 = smov [#allocation13]   ;;  %p2255_p2 = scmp.ge.s32.totalorder %s3338_s16, 5 }
  0x2c   : > { %s362_s21 = sshll.u32 %s3347_s19, 4  ;;  %s363_s21 = int_to_ptr.vmem [resolvable:$true] %s362_s21 }
  0x2d   : > { %2968 = dma.hbm_to_vmem [thread:$0]  (!%p3480_p0), %s361_s2, 4096, %s363_s21, [#allocation12], %s3341_s28, %s3341_s28, %s3342_s29  }
  0x2e   : > { %375 = sbr.rel (%p2255_p2) target bundleno = 89 (0x59), region = 52 }
  0x33   : > { %378 = sbr.rel (!%p3448_p5) target bundleno = 89 (0x59), region = 56  ;;  %s379_s30 = sand.u32 (%p3448_p5), 1, %s3334_s15  }
  0x34   : > { %s384_s1 = smul.u32 (%p3448_p5), 7, %s3338_s16  ;;  %s3534_s2 = scalar_lea.sflag (%p3448_p5), [#allocation3], %s379_s30 }
  0x35   : > { %s2922_s26 = smul.u32 (%p3448_p5), 56, %s379_s30 }
  0x36   : > { %s385_s12 = ssub.s32 (%p3448_p5), 32, %s384_s1 }
  0x37   : > { %p386_p3 = scmp.lt.s32.totalorder (%p3448_p5), %s385_s12, 7  ;;  %s383_s28 = scalar_lea.vmem (%p3448_p5), [#allocation2], %s2922_s26 }
  0x39   : > { %s3880_s12 = smov (!%p386_p3, %s385_s12), 7 }
  0x3a   : > { %s2256_s18 = sshll.u32 %s3880_s12, 3 }
  0x3b   : > { %s389_s13 = ssub.s32 56, %s2256_s18 }
  0x3c   : > { %s390_s22 = sshll.u32 %s389_s13, 4 }
  0x3d   : > { %391 = vsyncadd %s3534_s2, %s390_s22  ;;  %p3537_p5 = scmp.ne.s32.totalorder %s2256_s18, 0  ;;  %s2789_s29 = smul.u32 56, %s3338_s16 }
  0x3e   : > { %s3542_s3 = sshll.u32 %s383_s28, 4  ;;  %s2260_s10 = sshll.u32 %s3880_s12, 7  ;;  %s399_s3 = int_to_ptr.vmem [resolvable:$true] %s3542_s3 }
  0x3f   : > { %s394_s19 = scalar_lea.hbm %s3828_s0, %s2789_s29  ;;  %s3212_s1 = sshrl.u32 %s2260_s10, 4 }
  0x40   : > { %s396_s21 = sshll.u32 %s394_s19, 4  ;;  %s3221_s22 = scalar_lea.hbm %s3828_s0, 256  ;;  %s3549_s21 = int_to_ptr.hbm [resolvable:$true] %s396_s21 }
  0x41   : > { %s3210_s30 = sshra.s32 %s3549_s21, 4  ;;  %s3211_s30 = int_to_ptr.hbm [resolvable:$true] %s3210_s30 }
  0x42   : > { %s3217_s26 = scalar_lea.hbm %s3211_s30, %s3212_s1  ;;  %p3222_p10 = scmp.lt.s32.totalorder %s3211_s30, %s3828_s0 }
  0x43   : > { %p3218_p7 = scmp.ne.s32.totalorder %s3211_s30, %s3217_s26  ;;  %p3223_p1 = scmp.lt.s32.totalorder %s3221_s22, %s3217_s26 }
  0x45   : > { %p3219_p8 = pnand %p3218_p7, %p3537_p5  ;;  %p3224_p0 = por %p3223_p1, %p3222_p10 }
  0x47   : > { %p3220_p9 = pneg %p3219_p8 }
  0x49   : > { %p3225_p2 = pnand %p3224_p0, %p3220_p9 }
  0x4b   : > { %3228 = shalt.err (!%p3225_p2)
}
  0x4c   : > { %s3229_s11 = sshra.s32 %s399_s3, 4  ;;  %s3348_s19 = smov [#allocation2]   ;;  %s3230_s11 = int_to_ptr.vmem [resolvable:$true] %s3229_s11 }
  0x4d   : > { %s3236_s20 = scalar_lea.vmem %s3230_s11, %s3212_s1  ;;  %s3240_s18 = scalar_lea.vmem %s3348_s19, 112 }
  0x4e   : > { %p3237_p3 = scmp.ne.s32.totalorder %s3230_s11, %s3236_s20  ;;  %p3242_p4 = scmp.lt.s32.totalorder %s3240_s18, %s3236_s20 }
  0x50   : > { %p3238_p7 = pnand %p3237_p3, %p3537_p5 }
  0x52   : > { %p3239_p8 = pneg %p3238_p7 }
  0x54   : > { %p3244_p12 = pnand %p3242_p4, %p3239_p8 }
  0x56   : > { %3247 = shalt.err (!%p3244_p12)
}
  0x57   : > { %s3349_s30 = smov 128   ;;  %s3350_s26 = smov 8  }
  0x58   : > { %404 = dma.hbm_to_vmem [thread:$0]  (%p3537_p5), %s3549_s21, %s2260_s10, %s399_s3, %s3534_s2, %s3349_s30, %s3349_s30, %s3350_s26  }
  0x59 PF: > { %410 = sbr.rel (%p3469_p13) target bundleno = 815 (0x32f), region = 60  ;;  %s3577_s1 = sand.u32 (!%p3469_p13), 1, %s3330_s14  }
  0x5a   : > { %s2923_s13 = smul.u32 (!%p3469_p13), 56, %s3577_s1  ;;  %s413_s22 = scalar_lea.sflag (!%p3469_p13), [#allocation3], %s3577_s1 }
  0x5c   : > { %s3583_s28 = scalar_lea.vmem (!%p3469_p13), [#allocation2], %s2923_s13 }
  0x5e   : > { %3305 = dma.done.wait (%p3454_p6), %s413_s22, 896  }
  0x5f   : > { %3307 = vsyncadd (%p3454_p6), %s413_s22, 4294966400  ;;  %p3863_p4 = scmp.eq.s32.totalorder %s3430_s17, 0 }
  0x61   : > { %3309 = dma.done.wait (%p3863_p4), [#allocation6], 2080   ;;  %p3864_p12 = pmov %p3863_p4 }
  0x62   : > { %p3865_p13 = pmov %p3863_p4 }
  0x63   : > { %3311 = vsyncadd (%p3864_p12), [#allocation6], 4294965216 }
  0x64   : > { %3313 = dma.done.wait (%p3865_p13), [#allocation9], 8192   ;;  %p3866_p5 = pmov %p3863_p4 }
  0x65   : > { %p3867_p9 = pmov %p3863_p4 }
  0x66   : > { %3315 = vsyncadd (%p3866_p5), [#allocation9], 4294959104 }
  0x67   : > { %3317 = dma.done.wait (%p3867_p9), [#allocation12], 6144   ;;  %p3868_p10 = pmov %p3863_p4 }
  0x68   : > { %v2326_v0 = vld [vmem:[#allocation5 + $0x70] sm:$0xf]  ;;  %v2805_v1 = vld [vmem:[#allocation5 + $0x74] sm:$0xf0]  ;;  %v2804_v2 = vld [vmem:[#allocation5 + $0x74] sm:$0xf] }
  0x69   : > { %3319 = vsyncadd (%p3868_p10), [#allocation12], 4294961152  ;;  %v2327_v3 = vor.u32 %v2805_v1, %v2326_v0  ;;  %v2328_v4 = vld [vmem:[#allocation5 + $0x78] sm:$0xf0]  ;;  %v2318_v5 = vld [vmem:[#allocation5 + $0x60] sm:$0xf] }
  0x6a   : > { %v2803_v6 = vld [vmem:[#allocation5 + $0x64] sm:$0xf0]  ;;  %v2331_v7 = vor.u32 %v2804_v2, %v2328_v4  ;;  %v2802_v8 = vld [vmem:[#allocation5 + $0x64] sm:$0xf]  ;;  %v2320_v9 = vld [vmem:[#allocation5 + $0x68] sm:$0xf0] }
  0x6b   : > { %603 = vmatpush.bf16.msra.mxu0 %v2327_v3  ;;  %v2319_v10 = vor.u32 %v2803_v6, %v2318_v5  ;;  %v2323_v11 = vor.u32 %v2802_v8, %v2320_v9  ;;  %v2310_v12 = vld [vmem:[#allocation5 + $0x50] sm:$0xf]  ;;  %v2801_v13 = vld [vmem:[#allocation5 + $0x54] sm:$0xf0]  ;;  %v2800_v14 = vld [vmem:[#allocation5 + $0x54] sm:$0xf] }
  0x6c   : > { %631 = vmatpush.bf16.msra.mxu1 %v2331_v7  ;;  %v2312_v15 = vld [vmem:[#allocation5 + $0x58] sm:$0xf0]  ;;  %v2311_v16 = vor.u32 %v2801_v13, %v2310_v12  ;;  %v2302_v18 = vld [vmem:[#allocation5 + $0x40] sm:$0xf]  ;;  %v2799_v19 = vld [vmem:[#allocation5 + $0x44] sm:$0xf0] }
  0x6d   : > { %v2315_v17 = vor.u32 %v2800_v14, %v2312_v15  ;;  %v2798_v20 = vld [vmem:[#allocation5 + $0x44] sm:$0xf]  ;;  %v2304_v21 = vld [vmem:[#allocation5 + $0x48] sm:$0xf0]  ;;  %v2303_v22 = vor.u32 %v2799_v19, %v2302_v18  ;;  %v2294_v24 = vld [vmem:[#allocation5 + $0x30] sm:$0xf] }
  0x6e   : > { %v2307_v23 = vor.u32 %v2798_v20, %v2304_v21  ;;  %v2797_v25 = vld [vmem:[#allocation5 + $0x34] sm:$0xf0]  ;;  %v2796_v26 = vld [vmem:[#allocation5 + $0x34] sm:$0xf]  ;;  %v2296_v27 = vld [vmem:[#allocation5 + $0x38] sm:$0xf0] }
  0x6f   : > { %604 = vmatpush.bf16.msra.mxu0 %v2319_v10  ;;  %v2295_v28 = vor.u32 %v2797_v25, %v2294_v24  ;;  %v2299_v29 = vor.u32 %v2796_v26, %v2296_v27  ;;  %v2286_v30 = vld [vmem:[#allocation5 + $0x20] sm:$0xf]  ;;  %v2795_v31 = vld [vmem:[#allocation5 + $0x24] sm:$0xf0]  ;;  %v2794_v32 = vld [vmem:[#allocation5 + $0x24] sm:$0xf] }
  0x70   : > { %632 = vmatpush.bf16.msra.mxu1 %v2323_v11  ;;  %v2288_v33 = vld [vmem:[#allocation5 + $0x28] sm:$0xf0]  ;;  %v2287_v34 = vor.u32 %v2795_v31, %v2286_v30  ;;  %v2278_v36 = vld [vmem:[#allocation5 + $0x10] sm:$0xf]  ;;  %v2793_v37 = vld [vmem:[#allocation5 + $0x14] sm:$0xf0] }
  0x71   : > { %v2291_v35 = vor.u32 %v2794_v32, %v2288_v33  ;;  %v2792_v38 = vld [vmem:[#allocation5 + $0x14] sm:$0xf]  ;;  %v2280_v39 = vld [vmem:[#allocation5 + $0x18] sm:$0xf0]  ;;  %v2279_v40 = vor.u32 %v2793_v37, %v2278_v36  ;;  %v2270_v42 = vld [vmem:[#allocation5] sm:$0xf] }
  0x72   : > { %v2283_v41 = vor.u32 %v2792_v38, %v2280_v39  ;;  %v2791_v43 = vld [vmem:[#allocation5 + $0x4] sm:$0xf0]  ;;  %v2790_v44 = vld [vmem:[#allocation5 + $0x4] sm:$0xf]  ;;  %v2272_v45 = vld [vmem:[#allocation5 + $0x8] sm:$0xf0] }
  0x73   : > { %605 = vmatpush.bf16.msra.mxu0 %v2311_v16  ;;  %v2271_v46 = vor.u32 %v2791_v43, %v2270_v42  ;;  %v495_v47 = vld [vmem:[%s3583_s28] sm:$0xff]  ;;  %v496_v48 = vld [vmem:[%s3583_s28 + $0x8] sm:$0xff]  ;;  %v2275_v49 = vor.u32 %v2790_v44, %v2272_v45  ;;  %v497_v51 = vld [vmem:[%s3583_s28 + $0x10] sm:$0xff]  ;;  %s3745_s10 = scalar_lea.vmem [#allocation14], %s2923_s13  ;;  %s2093_s21 = scalar_lea.sflag [#allocation4], %s3577_s1 }
  0x74   : > { %633 = vmatpush.bf16.msra.mxu1 %v2315_v17  ;;  %v3603_v50 = vpack.c.bf16 %v496_v48, %v495_v47  ;;  %v498_v52 = vld [vmem:[%s3583_s28 + $0x18] sm:$0xff]  ;;  %v2820_v54 = vld [vmem:[#allocation8 + $0x74] sm:$0xf]  ;;  %v2390_v6 = vld [vmem:[#allocation8 + $0x70] sm:$0xf]  ;;  %s2100_s29 = smul.u32 (%p3461_p11), 7, %s3430_s17 }
  0x75   : > { %v3609_v53 = vpack.c.bf16 %v498_v52, %v497_v51  ;;  %v2392_v55 = vld [vmem:[#allocation8 + $0x78] sm:$0xf0]  ;;  %v2836_v56 = vld [vmem:[#allocation8 + $0xf4] sm:$0xf]  ;;  %v2818_v59 = vld [vmem:[#allocation8 + $0x64] sm:$0xf] }
  0x76   : > { %v2395_v57 = vor.u32 %v2820_v54, %v2392_v55  ;;  %v2456_v58 = vld [vmem:[#allocation8 + $0xf8] sm:$0xf0]  ;;  %v2384_v60 = vld [vmem:[#allocation8 + $0x68] sm:$0xf0]  ;;  %v2834_v62 = vld [vmem:[#allocation8 + $0xe4] sm:$0xf] }
  0x77   : > { %606 = vmatpush.bf16.msra.mxu0 %v2303_v22  ;;  %v2459_v61 = vor.u32 %v2836_v56, %v2456_v58  ;;  %v2448_v63 = vld [vmem:[#allocation8 + $0xe8] sm:$0xf0]  ;;  %v2387_v0 = vor.u32 %v2818_v59, %v2384_v60  ;;  %v2816_v2 = vld [vmem:[#allocation8 + $0x54] sm:$0xf]  ;;  %v2376_v3 = vld [vmem:[#allocation8 + $0x58] sm:$0xf0] }
  0x78   : > { %634 = vmatpush.bf16.msra.mxu1 %v2307_v23  ;;  %v2451_v1 = vor.u32 %v2834_v62, %v2448_v63  ;;  %v2832_v4 = vld [vmem:[#allocation8 + $0xd4] sm:$0xf]  ;;  %v2440_v5 = vld [vmem:[#allocation8 + $0xd8] sm:$0xf0]  ;;  %v2821_v7 = vld [vmem:[#allocation8 + $0x74] sm:$0xf0]  ;;  %v2379_v12 = vor.u32 %v2816_v2, %v2376_v3 }
  0x79   : > { %v2391_v8 = vor.u32 %v2821_v7, %v2390_v6  ;;  %v2454_v9 = vld [vmem:[#allocation8 + $0xf0] sm:$0xf]  ;;  %v2837_v10 = vld [vmem:[#allocation8 + $0xf4] sm:$0xf0]  ;;  %v2382_v11 = vld [vmem:[#allocation8 + $0x60] sm:$0xf]  ;;  %v2443_v19 = vor.u32 %v2832_v4, %v2440_v5 }
  0x7a   : > { %v2455_v13 = vor.u32 %v2837_v10, %v2454_v9  ;;  %v2819_v14 = vld [vmem:[#allocation8 + $0x64] sm:$0xf0]  ;;  %v2446_v15 = vld [vmem:[#allocation8 + $0xe0] sm:$0xf]  ;;  %v500_v18 = vld [vmem:[%s3583_s28 + $0x28] sm:$0xff]  ;;  %s2101_s11 = ssub.s32 (%p3461_p11), 32, %s2100_s29 }
  0x7b   : > { %607 = vmatpush.bf16.msra.mxu0 %v2295_v28  ;;  %v2835_v16 = vld [vmem:[#allocation8 + $0xe4] sm:$0xf0]  ;;  %942 = vmatpush.bf16.msra.mxu2 %v2391_v8  ;;  %v2383_v20 = vor.u32 %v2819_v14, %v2382_v11  ;;  %v2814_v21 = vld [vmem:[#allocation8 + $0x44] sm:$0xf]  ;;  %v2368_v22 = vld [vmem:[#allocation8 + $0x48] sm:$0xf0] }
  0x7c   : > { %635 = vmatpush.bf16.msra.mxu1 %v2299_v29  ;;  %v499_v17 = vld [vmem:[%s3583_s28 + $0x20] sm:$0xff]  ;;  %970 = vmatpush.bf16.msra.mxu3 %v2455_v13  ;;  %v2447_v24 = vor.u32 %v2835_v16, %v2446_v15  ;;  %v2817_v27 = vld [vmem:[#allocation8 + $0x54] sm:$0xf0]  ;;  %v2371_v31 = vor.u32 %v2814_v21, %v2368_v22  ;;  %v2424_v37 = vld [vmem:[#allocation8 + $0xb8] sm:$0xf0]  ;;  %p2102_p6 = scmp.lt.s32.totalorder (%p3461_p11), %s2101_s11, 7 }
  0x7d   : > { %v2830_v23 = vld [vmem:[#allocation8 + $0xc4] sm:$0xf]  ;;  %v2432_v25 = vld [vmem:[#allocation8 + $0xc8] sm:$0xf0]  ;;  %v2374_v26 = vld [vmem:[#allocation8 + $0x50] sm:$0xf]  ;;  %v3615_v28 = vpack.c.bf16 %v500_v18, %v499_v17 }
  0x7e   : > { %v2438_v29 = vld [vmem:[#allocation8 + $0xd0] sm:$0xf]  ;;  %v2833_v30 = vld [vmem:[#allocation8 + $0xd4] sm:$0xf0]  ;;  %v2435_v32 = vor.u32 %v2830_v23, %v2432_v25  ;;  %v2812_v33 = vld [vmem:[#allocation8 + $0x34] sm:$0xf] }
  0x7f   : > { %608 = vmatpush.bf16.msra.mxu0 %v2287_v34  ;;  %943 = vmatpush.bf16.msra.mxu2 %v2383_v20  ;;  %v2360_v34 = vld [vmem:[#allocation8 + $0x38] sm:$0xf0]  ;;  %v2828_v36 = vld [vmem:[#allocation8 + $0xb4] sm:$0xf]  ;;  %v2439_v38 = vor.u32 %v2833_v30, %v2438_v29  ;;  %v2366_v44 = vld [vmem:[#allocation8 + $0x40] sm:$0xf] }
  0x80   : > { %636 = vmatpush.bf16.msra.mxu1 %v2291_v35  ;;  %971 = vmatpush.bf16.msra.mxu3 %v2447_v24  ;;  %v2375_v35 = vor.u32 %v2817_v27, %v2374_v26  ;;  %v2363_v39 = vor.u32 %v2812_v33, %v2360_v34  ;;  %v522_v43 = vld [vmem:[#allocation7] sm:$0x3]  ;;  %v2815_v45 = vld [vmem:[#allocation8 + $0x44] sm:$0xf0]  ;;  %v2358_v51 = vld [vmem:[#allocation8 + $0x30] sm:$0xf] }
  0x81   : > { %667 = vst [vmem:[#allocation1] ss:$9 sm:$0xff] %v522_v43  ;;  %v2367_v47 = vor.u32 %v2815_v45, %v2366_v44  ;;  %v2831_v48 = vld [vmem:[#allocation8 + $0xc4] sm:$0xf0]  ;;  %v2813_v52 = vld [vmem:[#allocation8 + $0x34] sm:$0xf0] }
  0x82   : > { %v2422_v54 = vld [vmem:[#allocation8 + $0xb0] sm:$0xf]  ;;  %v2359_v55 = vor.u32 %v2813_v52, %v2358_v51  ;;  %v2829_v56 = vld [vmem:[#allocation8 + $0xb4] sm:$0xf0]  ;;  %v2352_v58 = vld [vmem:[#allocation8 + $0x28] sm:$0xf0] }
  0x83   : > { %609 = vmatpush.bf16.msra.mxu0 %v2279_v40  ;;  %v2427_v40 = vor.u32 %v2828_v36, %v2424_v37  ;;  %944 = vmatpush.bf16.msra.mxu2 %v2375_v35  ;;  %v2826_v59 = vld [vmem:[#allocation8 + $0xa4] sm:$0xf]  ;;  %v2423_v60 = vor.u32 %v2829_v56, %v2422_v54  ;;  %v2416_v62 = vld [vmem:[#allocation8 + $0xa8] sm:$0xf0]  ;;  %v2414_v2 = vld [vmem:[#allocation8 + $0xa0] sm:$0xf] }
  0x84   : > { %637 = vmatpush.bf16.msra.mxu1 %v2283_v41  ;;  %972 = vmatpush.bf16.msra.mxu3 %v2439_v38  ;;  %v501_v41 = vld [vmem:[%s3583_s28 + $0x30] sm:$0xff]  ;;  %v2419_v63 = vor.u32 %v2826_v59, %v2416_v62  ;;  %v2827_v4 = vld [vmem:[#allocation8 + $0xa4] sm:$0xf0]  ;;  %v2342_v11 = vld [vmem:[#allocation8 + $0x10] sm:$0xf] }
  0x85   : > { %v3620_v42 = vpack.c.bf16 %v501_v41, %v501_v41  ;;  %v2415_v5 = vor.u32 %v2827_v4, %v2414_v2  ;;  %v2808_v6 = vld [vmem:[#allocation8 + $0x14] sm:$0xf]  ;;  %v2344_v7 = vld [vmem:[#allocation8 + $0x18] sm:$0xf0]  ;;  %v2406_v15 = vld [vmem:[#allocation8 + $0x90] sm:$0xf] }
  0x86   : > { %v2824_v8 = vld [vmem:[#allocation8 + $0x94] sm:$0xf]  ;;  %v2347_v9 = vor.u32 %v2808_v6, %v2344_v7  ;;  %v2408_v10 = vld [vmem:[#allocation8 + $0x98] sm:$0xf0]  ;;  %v2825_v16 = vld [vmem:[#allocation8 + $0x94] sm:$0xf0] }
  0x87   : > { %610 = vmatpush.bf16.msra.mxu0 %v2271_v46  ;;  %v2430_v46 = vld [vmem:[#allocation8 + $0xc0] sm:$0xf]  ;;  %945 = vmatpush.bf16.msra.mxu2 %v2367_v47  ;;  %v2411_v13 = vor.u32 %v2824_v8, %v2408_v10  ;;  %v2407_v17 = vor.u32 %v2825_v16, %v2406_v15  ;;  %v2823_v22 = vld [vmem:[#allocation8 + $0x84] sm:$0xf0]  ;;  %v2806_v23 = vld [vmem:[#allocation8 + $0x4] sm:$0xf] }
  0x88   : > { %638 = vmatpush.bf16.msra.mxu1 %v2275_v49  ;;  %v2431_v49 = vor.u32 %v2831_v48, %v2430_v46  ;;  %v2334_v18 = vld [vmem:[#allocation8] sm:$0xf]  ;;  %v2336_v24 = vld [vmem:[#allocation8 + $0x8] sm:$0xf0]  ;;  %v2822_v27 = vld [vmem:[#allocation8 + $0x84] sm:$0xf] }
  0x89   : > { %v2398_v20 = vld [vmem:[#allocation8 + $0x80] sm:$0xf]  ;;  %v2339_v26 = vor.u32 %v2806_v23, %v2336_v24  ;;  %v2400_v29 = vld [vmem:[#allocation8 + $0x88] sm:$0xf0]  ;;  %v781_v33 = vld [vmem:[%s3832_s4] sm:$0x3] }
  0x8a   : > { %611 = vmatmul.bf16.vlgmr.msra.gmra.mxu0 %v3603_v50  ;;  %973 = vmatpush.bf16.msra.mxu3 %v2431_v49  ;;  %v2399_v25 = vor.u32 %v2823_v22, %v2398_v20  ;;  %v2403_v30 = vor.u32 %v2822_v27, %v2400_v29  ;;  %v2885_v56 = vld [vmem:[#allocation11 + $0x74] sm:$0xf0]  ;;  %v2520_v59 = vld [vmem:[#allocation11 + $0x78] sm:$0xf0]  ;;  %v2510_v8 = vld [vmem:[#allocation11 + $0x60] sm:$0xf] }
  0x8b   : > { %639 = vmatmul.bf16.vlgmr.msra.gmra.mxu1 %v3603_v50  ;;  %998 = vmatpush.bf16.msrb.mxu0 %v2395_v57  ;;  %v2810_v57 = vld [vmem:[#allocation8 + $0x24] sm:$0xf]  ;;  %v2494_v24 = vld [vmem:[#allocation11 + $0x40] sm:$0xf]  ;;  %v2496_v29 = vld [vmem:[#allocation11 + $0x48] sm:$0xf0] }
  0x8c   : > { %1026 = vmatpush.bf16.msrb.mxu1 %v2459_v61  ;;  %v2355_v61 = vor.u32 %v2810_v57, %v2352_v58  ;;  %946 = vmatpush.bf16.msra.mxu2 %v2359_v55  ;;  %v2518_v55 = vld [vmem:[#allocation11 + $0x70] sm:$0xf]  ;;  %v2884_v57 = vld [vmem:[#allocation11 + $0x74] sm:$0xf]  ;;  %v2882_v10 = vld [vmem:[#allocation11 + $0x64] sm:$0xf] }
  0x8d   : > { %v2519_v58 = vor.u32 %v2885_v56, %v2518_v55  ;;  %v2523_v62 = vor.u32 %v2884_v57, %v2520_v59  ;;  %v2878_v27 = vld [vmem:[#allocation11 + $0x44] sm:$0xf]  ;;  %v2488_v56 = vld [vmem:[#allocation11 + $0x38] sm:$0xf0]  ;;  %v2478_v57 = vld [vmem:[#allocation11 + $0x20] sm:$0xf] }
  0x8e   : > { %974 = vmatpush.bf16.msra.mxu3 %v2423_v60 }
  0x8f   : > { %999 = vmatpush.bf16.msrb.mxu0 %v2387_v0  ;;  %v2350_v0 = vld [vmem:[#allocation8 + $0x20] sm:$0xf] }
  0x90   : > { %1027 = vmatpush.bf16.msrb.mxu1 %v2451_v1  ;;  %v2811_v1 = vld [vmem:[#allocation8 + $0x24] sm:$0xf0] }
  0x91   : > { %v2351_v3 = vor.u32 %v2811_v1, %v2350_v0 }
  0x92   : > { %975 = vmatpush.bf16.msra.mxu3 %v2415_v5 }
  0x93   : > { %1000 = vmatpush.bf16.msrb.mxu0 %v2379_v12  ;;  %947 = vmatpush.bf16.msra.mxu2 %v2351_v3  ;;  %v2809_v12 = vld [vmem:[#allocation8 + $0x14] sm:$0xf0] }
  0x94   : > { %1028 = vmatpush.bf16.msrb.mxu1 %v2443_v19  ;;  %v2343_v14 = vor.u32 %v2809_v12, %v2342_v11  ;;  %v2807_v19 = vld [vmem:[#allocation8 + $0x4] sm:$0xf0]  ;;  %v2512_v12 = vld [vmem:[#allocation11 + $0x68] sm:$0xf0] }
  0x95   : > { %v2335_v21 = vor.u32 %v2807_v19, %v2334_v18  ;;  %v2515_v16 = vor.u32 %v2882_v10, %v2512_v12  ;;  %v2504_v18 = vld [vmem:[#allocation11 + $0x58] sm:$0xf0] }
  0x96   : > { %976 = vmatpush.bf16.msra.mxu3 %v2407_v17  ;;  %v2880_v17 = vld [vmem:[#allocation11 + $0x54] sm:$0xf] }
  0x97   : > { %1001 = vmatpush.bf16.msrb.mxu0 %v2371_v31  ;;  %948 = vmatpush.bf16.msra.mxu2 %v2343_v14  ;;  %v668_v31 = vld [vmem:[#allocation1] sm:$0xff]  ;;  %v2881_v14 = vld [vmem:[#allocation11 + $0x54] sm:$0xf0]  ;;  %v2507_v23 = vor.u32 %v2880_v17, %v2504_v18  ;;  %v2462_v17 = vld [vmem:[#allocation11] sm:$0xf] }
  0x98   : > { %1029 = vmatpush.bf16.msrb.mxu1 %v2435_v32  ;;  %v669_v32 = vld [vmem:[#allocation1 + $0x9] sm:$0xff]  ;;  %v670_v35 = vpack.i.b16 %v668_v31, %v668_v31  ;;  %v2871_v18 = vld [vmem:[#allocation11 + $0x4] sm:$0xf0] }
  0x99   : > { %1062 = vst [vmem:[#allocation1] ss:$9 sm:$0xff] %v781_v33  ;;  %v673_v36 = vpack.i.b16 %v669_v32, %v669_v32 }
  0x9a   : > { %616 = vmatmul.bf16.gmra.mxu0 %v3609_v53  ;;  %977 = vmatpush.bf16.msra.mxu3 %v2399_v25  ;;  %v2879_v25 = vld [vmem:[#allocation11 + $0x44] sm:$0xf0] }
  0x9b   : > { %644 = vmatmul.bf16.gmra.mxu1 %v3609_v53  ;;  %1002 = vmatpush.bf16.msrb.mxu0 %v2363_v39  ;;  %v672_v39 = vperm.slane %v670_v35, 0  ;;  %v2499_v35 = vor.u32 %v2878_v27, %v2496_v29  ;;  %v2463_v27 = vor.u32 %v2871_v18, %v2462_v17  ;;  %v2846_v17 = vld [vmem:[#allocation10 + $0x44] sm:$0xf] }
  0x9c   : > { %1030 = vmatpush.bf16.msrb.mxu1 %v2427_v40  ;;  %949 = vmatpush.bf16.msra.mxu2 %v2335_v21  ;;  %v675_v40 = vperm.slane %v673_v36, 0 }
  0x9d   : > { %v3627_v45 = vunpack.c.l.bf16 %v672_v39 }
  0x9e   : > { %v3629_v46 = vunpack.c.l.bf16 %v675_v40  ;;  %1301 = vmatpush.bf16.msrb.mxu3 %v2523_v62  ;;  %v2480_v62 = vld [vmem:[#allocation11 + $0x28] sm:$0xf0] }
  0x9f   : > { %1003 = vmatpush.bf16.msrb.mxu0 %v2355_v61 }
  0xa0   : > { %1031 = vmatpush.bf16.msrb.mxu1 %v2419_v63  ;;  %1273 = vmatpush.bf16.msrb.mxu2 %v2519_v58  ;;  %v2875_v58 = vld [vmem:[#allocation11 + $0x24] sm:$0xf0] }
  0xa2   : > { %1302 = vmatpush.bf16.msrb.mxu3 %v2515_v16 }
  0xa3   : > { %1004 = vmatpush.bf16.msrb.mxu0 %v2347_v9  ;;  %v2883_v9 = vld [vmem:[#allocation11 + $0x64] sm:$0xf0] }
  0xa4   : > { %1032 = vmatpush.bf16.msrb.mxu1 %v2411_v13  ;;  %v2511_v11 = vor.u32 %v2883_v9, %v2510_v8  ;;  %v2502_v13 = vld [vmem:[#allocation11 + $0x50] sm:$0xf]  ;;  %v2472_v8 = vld [vmem:[#allocation11 + $0x18] sm:$0xf0] }
  0xa5   : > { %v2503_v21 = vor.u32 %v2881_v14, %v2502_v13 }
  0xa6   : > { %1274 = vmatpush.bf16.msrb.mxu2 %v2511_v11  ;;  %1303 = vmatpush.bf16.msrb.mxu3 %v2507_v23 }
  0xa7   : > { %1005 = vmatpush.bf16.msrb.mxu0 %v2339_v26 }
  0xa8   : > { %1033 = vmatpush.bf16.msrb.mxu1 %v2403_v30 }
  0xaa   : > { %621 = vmatmul.bf16.gmra.mxu0 %v3615_v28  ;;  %1275 = vmatpush.bf16.msrb.mxu2 %v2503_v21 }
  0xab   : > { %649 = vmatmul.bf16.gmra.mxu1 %v3615_v28  ;;  %1304 = vmatpush.bf16.msrb.mxu3 %v2499_v35  ;;  %v2852_v35 = vld [vmem:[#allocation10 + $0x74] sm:$0xf] }
  0xba   : > { %626 = vmatmul.bf16.gmra.mxu0 %v3620_v42 }
  0xbb   : > { %654 = vmatmul.bf16.gmra.mxu1 %v3620_v42 }
 0x107   : > { %v612_v34 = vpop.f32.mrf.mxu0 }
 0x108   : > { %v640_v37 = vpop.f32.mrf.mxu1 }
 0x109   : > { %v659_v38 = vpack.c.bf16 %v640_v37, %v612_v34  ;;  %v2495_v34 = vor.u32 %v2879_v25, %v2494_v24 }
 0x10b   : > { %v676_v41 = vunpack.c.l.bf16 %v659_v38  ;;  %v677_v43 = vunpack.c.h.bf16 %v659_v38  ;;  %1276 = vmatpush.bf16.msrb.mxu2 %v2495_v34 }
 0x10d   : > { %v692_v52 = vadd.f32 %v3627_v45, %v676_v41  ;;  %v693_v54 = vadd.f32 %v3629_v46, %v677_v43 }
 0x10f   : > { %v614_v44 = vpop.f32.mrf.mxu0  ;;  %v727_v0 = vmax.f32 %v692_v52, 0.0  ;;  %v728_v2 = vmax.f32 %v693_v54, 0.0  ;;  %v2877_v52 = vld [vmem:[#allocation11 + $0x34] sm:$0xf0]  ;;  %v2876_v54 = vld [vmem:[#allocation11 + $0x34] sm:$0xf] }
 0x110   : > { %v642_v47 = vpop.f32.mrf.mxu1 }
 0x111   : > { %v660_v48 = vpack.c.bf16 %v642_v47, %v614_v44 }
 0x113   : > { %v678_v49 = vunpack.c.l.bf16 %v660_v48  ;;  %v679_v51 = vunpack.c.h.bf16 %v660_v48 }
 0x115   : > { %v694_v60 = vadd.f32 %v3627_v45, %v678_v49  ;;  %v695_v61 = vadd.f32 %v3629_v46, %v679_v51  ;;  %v2486_v51 = vld [vmem:[#allocation11 + $0x30] sm:$0xf] }
 0x116   : > { %v2487_v55 = vor.u32 %v2877_v52, %v2486_v51 }
 0x117   : > { %v617_v63 = vpop.f32.mrf.mxu0  ;;  %v729_v1 = vmax.f32 %v694_v60, 0.0  ;;  %v730_v3 = vmax.f32 %v695_v61, 0.0  ;;  %v2491_v60 = vor.u32 %v2876_v54, %v2488_v56  ;;  %v2874_v61 = vld [vmem:[#allocation11 + $0x24] sm:$0xf] }
 0x118   : > { %v645_v4 = vpop.f32.mrf.mxu1  ;;  %1277 = vmatpush.bf16.msrb.mxu2 %v2487_v55 }
 0x119   : > { %v741_v5 = vpack.c.bf16 %v729_v1, %v727_v0  ;;  %v742_v6 = vpack.c.bf16 %v730_v3, %v728_v2  ;;  %v661_v7 = vpack.c.bf16 %v645_v4, %v617_v63  ;;  %v2479_v1 = vor.u32 %v2875_v58, %v2478_v57  ;;  %1305 = vmatpush.bf16.msrb.mxu3 %v2491_v60  ;;  %v2470_v4 = vld [vmem:[#allocation11 + $0x10] sm:$0xf]  ;;  %v2869_v58 = vld [vmem:[#allocation10 + $0xf4] sm:$0xf0] }
 0x11a   : > { %v2483_v3 = vor.u32 %v2874_v61, %v2480_v62  ;;  %v2646_v57 = vld [vmem:[#allocation10 + $0xf0] sm:$0xf]  ;;  %v2576_v61 = vld [vmem:[#allocation10 + $0x68] sm:$0xf0]  ;;  %v2866_v62 = vld [vmem:[#allocation10 + $0xe4] sm:$0xf] }
 0x11b   : > { %950 = vmatmul.bf16.vlgmr.msra.gmra.mxu2 %v741_v5  ;;  %978 = vmatmul.bf16.vlgmr.msra.gmra.mxu3 %v742_v6  ;;  %v680_v15 = vunpack.c.l.bf16 %v661_v7  ;;  %v681_v19 = vunpack.c.h.bf16 %v661_v7  ;;  %v2872_v7 = vld [vmem:[#allocation11 + $0x14] sm:$0xf]  ;;  %v2647_v60 = vor.u32 %v2869_v58, %v2646_v57  ;;  %v2859_v58 = vld [vmem:[#allocation10 + $0xa4] sm:$0xf0] }
 0x11c   : > { %1006 = vmatmul.bf16.vlgmr.msrb.gmra.mxu0 %v741_v5  ;;  %1034 = vmatmul.bf16.vlgmr.msrb.gmra.mxu1 %v742_v6  ;;  %v2873_v5 = vld [vmem:[#allocation11 + $0x14] sm:$0xf0]  ;;  %v2475_v14 = vor.u32 %v2872_v7, %v2472_v8 }
 0x11d   : > { %v696_v30 = vadd.f32 %v3627_v45, %v680_v15  ;;  %v697_v33 = vadd.f32 %v3629_v46, %v681_v19  ;;  %1278 = vmatpush.bf16.msrb.mxu2 %v2479_v1  ;;  %v2471_v13 = vor.u32 %v2873_v5, %v2470_v4  ;;  %1306 = vmatpush.bf16.msrb.mxu3 %v2483_v3  ;;  %v2870_v19 = vld [vmem:[#allocation11 + $0x4] sm:$0xf]  ;;  %v2851_v1 = vld [vmem:[#allocation10 + $0x64] sm:$0xf0]  ;;  %v2848_v5 = vld [vmem:[#allocation10 + $0x54] sm:$0xf] }
 0x11e   : > { %1517 = vmatpush.bf16.msra.mxu1 %v2647_v60  ;;  %v2867_v4 = vld [vmem:[#allocation10 + $0xe4] sm:$0xf0] }
 0x11f   : > { %v619_v20 = vpop.f32.mrf.mxu0  ;;  %v731_v39 = vmax.f32 %v696_v30, 0.0  ;;  %v732_v41 = vmax.f32 %v697_v33, 0.0 }
 0x120   : > { %v647_v22 = vpop.f32.mrf.mxu1 }
 0x121   : > { %v662_v26 = vpack.c.bf16 %v647_v22, %v619_v20  ;;  %v2464_v20 = vld [vmem:[#allocation11 + $0x8] sm:$0xf0]  ;;  %1279 = vmatpush.bf16.msrb.mxu2 %v2471_v13  ;;  %1307 = vmatpush.bf16.msrb.mxu3 %v2475_v14  ;;  %v2849_v13 = vld [vmem:[#allocation10 + $0x54] sm:$0xf0] }
 0x123   : > { %v682_v31 = vunpack.c.l.bf16 %v662_v26  ;;  %v683_v32 = vunpack.c.h.bf16 %v662_v26 }
 0x125   : > { %v698_v36 = vadd.f32 %v3627_v45, %v682_v31  ;;  %v699_v37 = vadd.f32 %v3629_v46, %v683_v32  ;;  %v2467_v32 = vor.u32 %v2870_v19, %v2464_v20  ;;  %1280 = vmatpush.bf16.msrb.mxu2 %v2463_v27  ;;  %v2560_v19 = vld [vmem:[#allocation10 + $0x48] sm:$0xf0]  ;;  %v2862_v20 = vld [vmem:[#allocation10 + $0xc4] sm:$0xf] }
 0x127   : > { %v622_v38 = vpop.f32.mrf.mxu0  ;;  %v733_v40 = vmax.f32 %v698_v36, 0.0  ;;  %v734_v43 = vmax.f32 %v699_v37, 0.0  ;;  %v2584_v36 = vld [vmem:[#allocation10 + $0x78] sm:$0xf0]  ;;  %v2868_v37 = vld [vmem:[#allocation10 + $0xf4] sm:$0xf]  ;;  %1308 = vmatpush.bf16.msrb.mxu3 %v2467_v32 }
 0x128   : > { %v650_v44 = vpop.f32.mrf.mxu1 }
 0x129   : > { %v743_v47 = vpack.c.bf16 %v733_v40, %v731_v39  ;;  %v744_v48 = vpack.c.bf16 %v734_v43, %v732_v41  ;;  %v663_v49 = vpack.c.bf16 %v650_v44, %v622_v38  ;;  %v2587_v38 = vor.u32 %v2852_v35, %v2584_v36  ;;  %v2648_v39 = vld [vmem:[#allocation10 + $0xf8] sm:$0xf0]  ;;  %v2582_v40 = vld [vmem:[#allocation10 + $0x70] sm:$0xf]  ;;  %v2853_v41 = vld [vmem:[#allocation10 + $0x74] sm:$0xf0] }
 0x12a   : > { %v2651_v43 = vor.u32 %v2868_v37, %v2648_v39  ;;  %v2583_v44 = vor.u32 %v2853_v41, %v2582_v40  ;;  %v2550_v36 = vld [vmem:[#allocation10 + $0x30] sm:$0xf]  ;;  %v2845_v37 = vld [vmem:[#allocation10 + $0x34] sm:$0xf0]  ;;  %v2842_v41 = vld [vmem:[#allocation10 + $0x24] sm:$0xf] }
 0x12b   : > { %955 = vmatmul.bf16.gmra.mxu2 %v743_v47  ;;  %983 = vmatmul.bf16.gmra.mxu3 %v744_v48  ;;  %v684_v59 = vunpack.c.l.bf16 %v663_v49  ;;  %v685_v63 = vunpack.c.h.bf16 %v663_v49  ;;  %v2551_v39 = vor.u32 %v2845_v37, %v2550_v36  ;;  %v2861_v40 = vld [vmem:[#allocation10 + $0xb4] sm:$0xf0] }
 0x12c   : > { %1011 = vmatmul.bf16.gmra.mxu0 %v743_v47  ;;  %1039 = vmatmul.bf16.gmra.mxu1 %v744_v48 }
 0x12d   : > { %v700_v9 = vadd.f32 %v3627_v45, %v684_v59  ;;  %v701_v12 = vadd.f32 %v3629_v46, %v685_v63  ;;  %1545 = vmatpush.bf16.msra.mxu2 %v2587_v38  ;;  %1573 = vmatpush.bf16.msra.mxu3 %v2651_v43  ;;  %v2850_v59 = vld [vmem:[#allocation10 + $0x64] sm:$0xf]  ;;  %v2614_v38 = vld [vmem:[#allocation10 + $0xb0] sm:$0xf]  ;;  %v2544_v43 = vld [vmem:[#allocation10 + $0x28] sm:$0xf0] }
 0x12e   : > { %1489 = vmatpush.bf16.msra.mxu0 %v2583_v44  ;;  %v2579_v63 = vor.u32 %v2850_v59, %v2576_v61  ;;  %v2615_v44 = vor.u32 %v2861_v40, %v2614_v38  ;;  %v2840_v59 = vld [vmem:[#allocation10 + $0x14] sm:$0xf]  ;;  %v2536_v61 = vld [vmem:[#allocation10 + $0x18] sm:$0xf0] }
 0x12f   : > { %v624_v0 = vpop.f32.mrf.mxu0  ;;  %v735_v21 = vmax.f32 %v700_v9, 0.0  ;;  %v736_v23 = vmax.f32 %v701_v12, 0.0  ;;  %v2864_v9 = vld [vmem:[#allocation10 + $0xd4] sm:$0xf] }
 0x130   : > { %v652_v2 = vpop.f32.mrf.mxu1 }
 0x131   : > { %v664_v6 = vpack.c.bf16 %v652_v2, %v624_v0  ;;  %v2574_v0 = vld [vmem:[#allocation10 + $0x60] sm:$0xf]  ;;  %1546 = vmatpush.bf16.msra.mxu2 %v2579_v63  ;;  %v2600_v63 = vld [vmem:[#allocation10 + $0x98] sm:$0xf0] }
 0x132   : > { %v2638_v2 = vld [vmem:[#allocation10 + $0xe0] sm:$0xf]  ;;  %v2575_v3 = vor.u32 %v2851_v1, %v2574_v0  ;;  %v2534_v0 = vld [vmem:[#allocation10 + $0x10] sm:$0xf]  ;;  %v2841_v1 = vld [vmem:[#allocation10 + $0x14] sm:$0xf0] }
 0x133   : > { %v686_v10 = vunpack.c.l.bf16 %v664_v6  ;;  %v687_v11 = vunpack.c.h.bf16 %v664_v6  ;;  %v2568_v6 = vld [vmem:[#allocation10 + $0x58] sm:$0xf0]  ;;  %v2639_v7 = vor.u32 %v2867_v4, %v2638_v2  ;;  %v2598_v2 = vld [vmem:[#allocation10 + $0x90] sm:$0xf]  ;;  %v2857_v4 = vld [vmem:[#allocation10 + $0x94] sm:$0xf0] }
 0x134   : > { %v2571_v8 = vor.u32 %v2848_v5, %v2568_v6  ;;  %1490 = vmatpush.bf16.msra.mxu0 %v2575_v3  ;;  %v2535_v3 = vor.u32 %v2841_v1, %v2534_v0  ;;  %v2599_v5 = vor.u32 %v2857_v4, %v2598_v2  ;;  %v2838_v6 = vld [vmem:[#allocation10 + $0x4] sm:$0xf] }
 0x135   : > { %v702_v15 = vadd.f32 %v3627_v45, %v686_v10  ;;  %v703_v16 = vadd.f32 %v3629_v46, %v687_v11  ;;  %v2632_v10 = vld [vmem:[#allocation10 + $0xd8] sm:$0xf0]  ;;  %v2566_v11 = vld [vmem:[#allocation10 + $0x50] sm:$0xf]  ;;  %1518 = vmatpush.bf16.msra.mxu1 %v2639_v7  ;;  %v2528_v7 = vld [vmem:[#allocation10 + $0x8] sm:$0xf0] }
 0x136   : > { %v2635_v12 = vor.u32 %v2864_v9, %v2632_v10  ;;  %v2567_v14 = vor.u32 %v2849_v13, %v2566_v11  ;;  %1547 = vmatpush.bf16.msra.mxu2 %v2571_v8  ;;  %v2854_v8 = vld [vmem:[#allocation10 + $0x84] sm:$0xf]  ;;  %v2531_v9 = vor.u32 %v2838_v6, %v2528_v7  ;;  %v2592_v10 = vld [vmem:[#allocation10 + $0x88] sm:$0xf0]  ;;  %v2526_v11 = vld [vmem:[#allocation10] sm:$0xf] }
 0x137   : > { %v737_v22 = vmax.f32 %v702_v15, 0.0  ;;  %v738_v24 = vmax.f32 %v703_v16, 0.0  ;;  %v627_v25 = vpop.f32.mrf.mxu0  ;;  %v2630_v15 = vld [vmem:[#allocation10 + $0xd0] sm:$0xf]  ;;  %v2865_v16 = vld [vmem:[#allocation10 + $0xd4] sm:$0xf0]  ;;  %v2595_v13 = vor.u32 %v2854_v8, %v2592_v10 }
 0x138   : > { %v655_v26 = vpop.f32.mrf.mxu1  ;;  %1491 = vmatpush.bf16.msra.mxu0 %v2567_v14  ;;  %v2631_v18 = vor.u32 %v2865_v16, %v2630_v15  ;;  %v2590_v15 = vld [vmem:[#allocation10 + $0x80] sm:$0xf]  ;;  %v2855_v16 = vld [vmem:[#allocation10 + $0x84] sm:$0xf0] }
 0x139   : > { %v745_v29 = vpack.c.bf16 %v737_v22, %v735_v21  ;;  %v746_v30 = vpack.c.bf16 %v738_v24, %v736_v23  ;;  %v665_v31 = vpack.c.bf16 %v655_v26, %v627_v25  ;;  %v2624_v21 = vld [vmem:[#allocation10 + $0xc8] sm:$0xf0]  ;;  %v2563_v22 = vor.u32 %v2846_v17, %v2560_v19  ;;  %v2558_v24 = vld [vmem:[#allocation10 + $0x40] sm:$0xf]  ;;  %v2847_v25 = vld [vmem:[#allocation10 + $0x44] sm:$0xf0] }
 0x13a   : > { %v2627_v23 = vor.u32 %v2862_v20, %v2624_v21  ;;  %v2622_v26 = vld [vmem:[#allocation10 + $0xc0] sm:$0xf]  ;;  %1519 = vmatpush.bf16.msra.mxu1 %v2631_v18  ;;  %v2559_v27 = vor.u32 %v2847_v25, %v2558_v24 }
 0x13b   : > { %960 = vmatmul.bf16.gmra.mxu2 %v745_v29  ;;  %988 = vmatmul.bf16.gmra.mxu3 %v746_v30  ;;  %v688_v33 = vunpack.c.l.bf16 %v665_v31  ;;  %v689_v34 = vunpack.c.h.bf16 %v665_v31  ;;  %v2552_v31 = vld [vmem:[#allocation10 + $0x38] sm:$0xf0] }
 0x13c   : > { %1016 = vmatmul.bf16.gmra.mxu0 %v745_v29  ;;  %1044 = vmatmul.bf16.gmra.mxu1 %v746_v30  ;;  %v2863_v29 = vld [vmem:[#allocation10 + $0xc4] sm:$0xf0]  ;;  %v2844_v30 = vld [vmem:[#allocation10 + $0x34] sm:$0xf] }
 0x13d   : > { %v704_v48 = vadd.f32 %v3627_v45, %v688_v33  ;;  %v705_v49 = vadd.f32 %v3629_v46, %v689_v34  ;;  %v2640_v45 = vld [vmem:[#allocation10 + $0xe8] sm:$0xf0]  ;;  %1548 = vmatpush.bf16.msra.mxu2 %v2563_v22  ;;  %v2555_v32 = vor.u32 %v2844_v30, %v2552_v31  ;;  %v2860_v33 = vld [vmem:[#allocation10 + $0xb4] sm:$0xf]  ;;  %v2616_v34 = vld [vmem:[#allocation10 + $0xb8] sm:$0xf0]  ;;  %1492 = vmatpush.bf16.msra.mxu0 %v2559_v27 }
 0x13e   : > { %v2643_v46 = vor.u32 %v2866_v62, %v2640_v45  ;;  %v2619_v35 = vor.u32 %v2860_v33, %v2616_v34  ;;  %v2856_v62 = vld [vmem:[#allocation10 + $0x94] sm:$0xf]  ;;  %v2539_v45 = vor.u32 %v2840_v59, %v2536_v61 }
 0x13f   : > { %v629_v47 = vpop.f32.mrf.mxu0  ;;  %v739_v52 = vmax.f32 %v704_v48, 0.0  ;;  %v740_v54 = vmax.f32 %v705_v49, 0.0  ;;  %v2858_v48 = vld [vmem:[#allocation10 + $0xa4] sm:$0xf]  ;;  %v2608_v49 = vld [vmem:[#allocation10 + $0xa8] sm:$0xf0] }
 0x140   : > { %v657_v51 = vpop.f32.mrf.mxu1  ;;  %1574 = vmatpush.bf16.msra.mxu3 %v2643_v46  ;;  %v2547_v47 = vor.u32 %v2842_v41, %v2544_v43  ;;  %v2603_v46 = vor.u32 %v2856_v62, %v2600_v63 }
 0x141   : > { %v747_v55 = vpack.c.bf16 %v739_v52, %v739_v52  ;;  %v748_v56 = vpack.c.bf16 %v740_v54, %v740_v54  ;;  %1549 = vmatpush.bf16.msra.mxu2 %v2555_v32  ;;  %1493 = vmatpush.bf16.msra.mxu0 %v2551_v39  ;;  %v2611_v51 = vor.u32 %v2858_v48, %v2608_v49  ;;  %v1064_v52 = vld [vmem:[#allocation1 + $0x9] sm:$0xff]  ;;  %v2542_v54 = vld [vmem:[#allocation10 + $0x20] sm:$0xf] }
 0x144   : > { %1575 = vmatpush.bf16.msra.mxu3 %v2635_v12  ;;  %v2839_v12 = vld [vmem:[#allocation10 + $0x4] sm:$0xf0] }
 0x145   : > { %1550 = vmatpush.bf16.msra.mxu2 %v2547_v47  ;;  %v2527_v14 = vor.u32 %v2839_v12, %v2526_v11 }
 0x148   : > { %1576 = vmatpush.bf16.msra.mxu3 %v2627_v23  ;;  %v1068_v23 = vpack.i.b16 %v1064_v52, %v1064_v52 }
 0x149   : > { %1551 = vmatpush.bf16.msra.mxu2 %v2539_v45 }
 0x14a   : > { %v1070_v30 = vperm.slane %v1068_v23, 0 }
 0x14b   : > { %965 = vmatmul.bf16.gmra.mxu2 %v747_v55  ;;  %993 = vmatmul.bf16.gmra.mxu3 %v748_v56 }
 0x14c   : > { %1021 = vmatmul.bf16.gmra.mxu0 %v747_v55  ;;  %1049 = vmatmul.bf16.gmra.mxu1 %v748_v56  ;;  %v2843_v55 = vld [vmem:[#allocation10 + $0x24] sm:$0xf0]  ;;  %v2606_v56 = vld [vmem:[#allocation10 + $0xa0] sm:$0xf] }
 0x14d   : > { %1577 = vmatpush.bf16.msra.mxu3 %v2619_v35  ;;  %v2543_v57 = vor.u32 %v2843_v55, %v2542_v54  ;;  %v2607_v60 = vor.u32 %v2859_v58, %v2606_v56  ;;  %1552 = vmatpush.bf16.msra.mxu2 %v2531_v9  ;;  %v3658_v35 = vunpack.c.l.bf16 %v1070_v30 }
 0x14f   : > { %1494 = vmatpush.bf16.msra.mxu0 %v2543_v57 }
 0x151   : > { %1578 = vmatpush.bf16.msra.mxu3 %v2611_v51 }
 0x153   : > { %1495 = vmatpush.bf16.msra.mxu0 %v2535_v3 }
 0x155   : > { %1579 = vmatpush.bf16.msra.mxu3 %v2603_v46 }
 0x157   : > { %1496 = vmatpush.bf16.msra.mxu0 %v2527_v14 }
 0x159   : > { %1580 = vmatpush.bf16.msra.mxu3 %v2595_v13 }
 0x15b   : > { %1281 = vmatmul.bf16.vlgmr.msrb.gmra.mxu2 %v3603_v50  ;;  %1309 = vmatmul.bf16.vlgmr.msrb.gmra.mxu3 %v3603_v50  ;;  %v2623_v50 = vor.u32 %v2863_v29, %v2622_v26 }
 0x15d   : > { %1520 = vmatpush.bf16.msra.mxu1 %v2623_v50 }
 0x161   : > { %1521 = vmatpush.bf16.msra.mxu1 %v2615_v44 }
 0x165   : > { %1522 = vmatpush.bf16.msra.mxu1 %v2607_v60 }
 0x169   : > { %1523 = vmatpush.bf16.msra.mxu1 %v2599_v5 }
 0x16b   : > { %1286 = vmatmul.bf16.gmra.mxu2 %v3609_v53  ;;  %1314 = vmatmul.bf16.gmra.mxu3 %v3609_v53  ;;  %v1063_v53 = vld [vmem:[#allocation1] sm:$0xff] }
 0x16c   : > { %v1065_v21 = vpack.i.b16 %v1063_v53, %v1063_v53 }
 0x16e   : > { %v1067_v29 = vperm.slane %v1065_v21, 0 }
 0x170   : > { %v3656_v50 = vunpack.c.l.bf16 %v1067_v29 }
 0x17b   : > { %1291 = vmatmul.bf16.gmra.mxu2 %v3615_v28  ;;  %1319 = vmatmul.bf16.gmra.mxu3 %v3615_v28  ;;  %v1192_v28 = vld [vmem:[%s3835_s7] sm:$0x3] }
 0x17c   : > { %1609 = vst [vmem:[#allocation1] ss:$9 sm:$0xff] %v1192_v28 }
 0x18b   : > { %1296 = vmatmul.bf16.gmra.mxu2 %v3620_v42  ;;  %1324 = vmatmul.bf16.gmra.mxu3 %v3620_v42  ;;  %v2591_v42 = vor.u32 %v2855_v16, %v2590_v15 }
 0x18d   : > { %1524 = vmatpush.bf16.msra.mxu1 %v2591_v42 }
 0x199   : > { %v1007_v17 = vpop.f32.mrf.mxu0  ;;  %v1035_v18 = vpop.f32.mrf.mxu1 }
 0x19a   : > { %v1036_v24 = vadd.f32 %v1035_v18, %v1007_v17 }
 0x19e   : > { %v951_v19 = vpop.f32.mrf.mxu2  ;;  %v979_v20 = vpop.f32.mrf.mxu3 }
 0x19f   : > { %v980_v22 = vadd.f32 %v979_v20, %v951_v19 }
 0x1a1   : > { %v1009_v25 = vpop.f32.mrf.mxu0  ;;  %v1037_v26 = vpop.f32.mrf.mxu1  ;;  %v1054_v27 = vpack.c.bf16 %v1036_v24, %v980_v22 }
 0x1a2   : > { %v1038_v36 = vadd.f32 %v1037_v26, %v1009_v25 }
 0x1a3   : > { %v1071_v31 = vunpack.c.l.bf16 %v1054_v27  ;;  %v1072_v34 = vunpack.c.h.bf16 %v1054_v27 }
 0x1a5   : > { %v1087_v41 = vadd.f32 %v3656_v50, %v1071_v31  ;;  %v1088_v43 = vadd.f32 %v3658_v35, %v1072_v34 }
 0x1a6   : > { %v953_v32 = vpop.f32.mrf.mxu2  ;;  %v981_v33 = vpop.f32.mrf.mxu3 }
 0x1a7   : > { %v982_v37 = vadd.f32 %v981_v33, %v953_v32  ;;  %v1122_v51 = vmax.f32 %v1087_v41, 0.0  ;;  %v1123_v54 = vmax.f32 %v1088_v43, 0.0 }
 0x1a9   : > { %v1055_v38 = vpack.c.bf16 %v1038_v36, %v982_v37  ;;  %v1012_v39 = vpop.f32.mrf.mxu0  ;;  %v1040_v40 = vpop.f32.mrf.mxu1 }
 0x1aa   : > { %v1041_v57 = vadd.f32 %v1040_v40, %v1012_v39 }
 0x1ab   : > { %v1073_v44 = vunpack.c.l.bf16 %v1055_v38  ;;  %v1074_v47 = vunpack.c.h.bf16 %v1055_v38 }
 0x1ad   : > { %v1089_v48 = vadd.f32 %v3656_v50, %v1073_v44  ;;  %v1090_v49 = vadd.f32 %v3658_v35, %v1074_v47 }
 0x1ae   : > { %v956_v53 = vpop.f32.mrf.mxu2  ;;  %v984_v52 = vpop.f32.mrf.mxu3 }
 0x1af   : > { %v1124_v55 = vmax.f32 %v1089_v48, 0.0  ;;  %v1125_v56 = vmax.f32 %v1090_v49, 0.0  ;;  %v985_v28 = vadd.f32 %v984_v52, %v956_v53 }
 0x1b1   : > { %v1014_v58 = vpop.f32.mrf.mxu0  ;;  %v1042_v59 = vpop.f32.mrf.mxu1  ;;  %v1136_v60 = vpack.c.bf16 %v1124_v55, %v1122_v51  ;;  %v1137_v61 = vpack.c.bf16 %v1125_v56, %v1123_v54  ;;  %v1056_v62 = vpack.c.bf16 %v1041_v57, %v985_v28 }
 0x1b2   : > { %v1043_v1 = vadd.f32 %v1042_v59, %v1014_v58 }
 0x1b3   : > { %1497 = vmatmul.bf16.vlgmr.msra.gmra.mxu0 %v1136_v60  ;;  %1525 = vmatmul.bf16.vlgmr.msra.gmra.mxu1 %v1137_v61  ;;  %v1075_v45 = vunpack.c.l.bf16 %v1056_v62  ;;  %v1076_v0 = vunpack.c.h.bf16 %v1056_v62  ;;  %v2712_v62 = vld [vmem:[#allocation13 + $0x78] sm:$0xf0] }
 0x1b4   : > { %1553 = vmatmul.bf16.vlgmr.msra.gmra.mxu2 %v1136_v60  ;;  %1581 = vmatmul.bf16.vlgmr.msra.gmra.mxu3 %v1137_v61  ;;  %v2900_v61 = vld [vmem:[#allocation13 + $0x74] sm:$0xf] }
 0x1b5   : > { %v1091_v6 = vadd.f32 %v3656_v50, %v1075_v45  ;;  %v1092_v9 = vadd.f32 %v3658_v35, %v1076_v0  ;;  %v2916_v45 = vld [vmem:[#allocation13 + $0xf4] sm:$0xf]  ;;  %v2715_v0 = vor.u32 %v2900_v61, %v2712_v62 }
 0x1b6   : > { %v958_v63 = vpop.f32.mrf.mxu2  ;;  %v986_v46 = vpop.f32.mrf.mxu3  ;;  %v2908_v62 = vld [vmem:[#allocation13 + $0xb4] sm:$0xf] }
 0x1b7   : > { %v987_v2 = vadd.f32 %v986_v46, %v958_v63  ;;  %v1126_v14 = vmax.f32 %v1091_v6, 0.0  ;;  %v1127_v42 = vmax.f32 %v1092_v9, 0.0  ;;  %1940 = vmatpush.bf16.msrb.mxu2 %v2715_v0  ;;  %v2774_v9 = vld [vmem:[#allocation13 + $0xf0] sm:$0xf] }
 0x1b9   : > { %v1057_v3 = vpack.c.bf16 %v1043_v1, %v987_v2  ;;  %v1017_v4 = vpop.f32.mrf.mxu0  ;;  %v1045_v5 = vpop.f32.mrf.mxu1  ;;  %v2776_v1 = vld [vmem:[#allocation13 + $0xf8] sm:$0xf0] }
 0x1ba   : > { %v1046_v18 = vadd.f32 %v1045_v5, %v1017_v4  ;;  %v2779_v2 = vor.u32 %v2916_v45, %v2776_v1  ;;  %v2744_v45 = vld [vmem:[#allocation13 + $0xb8] sm:$0xf0] }
 0x1bb   : > { %v1077_v7 = vunpack.c.l.bf16 %v1057_v3  ;;  %v1078_v8 = vunpack.c.h.bf16 %v1057_v3 }
 0x1bc   : > { %1968 = vmatpush.bf16.msrb.mxu3 %v2779_v2 }
 0x1bd   : > { %v1093_v10 = vadd.f32 %v3656_v50, %v1077_v7  ;;  %v1094_v11 = vadd.f32 %v3658_v35, %v1078_v8  ;;  %v2710_v7 = vld [vmem:[#allocation13 + $0x70] sm:$0xf]  ;;  %v2901_v8 = vld [vmem:[#allocation13 + $0x74] sm:$0xf0] }
 0x1be   : > { %v961_v12 = vpop.f32.mrf.mxu2  ;;  %v989_v13 = vpop.f32.mrf.mxu3 }
 0x1bf   : > { %v990_v15 = vadd.f32 %v989_v13, %v961_v12  ;;  %v1128_v16 = vmax.f32 %v1093_v10, 0.0  ;;  %v1129_v17 = vmax.f32 %v1094_v11, 0.0  ;;  %v2711_v12 = vor.u32 %v2901_v8, %v2710_v7  ;;  %v2898_v13 = vld [vmem:[#allocation13 + $0x64] sm:$0xf]  ;;  %v2678_v7 = vld [vmem:[#allocation13 + $0x30] sm:$0xf] }
 0x1c0   : > { %v2893_v8 = vld [vmem:[#allocation13 + $0x34] sm:$0xf0] }
 0x1c1   : > { %v1019_v19 = vpop.f32.mrf.mxu0  ;;  %v1047_v20 = vpop.f32.mrf.mxu1  ;;  %v1138_v21 = vpack.c.bf16 %v1128_v16, %v1126_v14  ;;  %v1139_v22 = vpack.c.bf16 %v1129_v17, %v1127_v42  ;;  %v1058_v23 = vpack.c.bf16 %v1046_v18, %v990_v15  ;;  %v2914_v16 = vld [vmem:[#allocation13 + $0xe4] sm:$0xf]  ;;  %v2768_v42 = vld [vmem:[#allocation13 + $0xe8] sm:$0xf0]  ;;  %1884 = vmatpush.bf16.msrb.mxu0 %v2711_v12 }
 0x1c2   : > { %v1048_v29 = vadd.f32 %v1047_v20, %v1019_v19  ;;  %v2771_v17 = vor.u32 %v2914_v16, %v2768_v42  ;;  %v2702_v20 = vld [vmem:[#allocation13 + $0x60] sm:$0xf]  ;;  %v2890_v12 = vld [vmem:[#allocation13 + $0x24] sm:$0xf] }
 0x1c3   : > { %1502 = vmatmul.bf16.gmra.mxu0 %v1138_v21  ;;  %1530 = vmatmul.bf16.gmra.mxu1 %v1139_v22  ;;  %v1079_v24 = vunpack.c.l.bf16 %v1058_v23  ;;  %v1080_v27 = vunpack.c.h.bf16 %v1058_v23 }
 0x1c4   : > { %1558 = vmatmul.bf16.gmra.mxu2 %v1138_v21  ;;  %1586 = vmatmul.bf16.gmra.mxu3 %v1139_v22  ;;  %v2899_v21 = vld [vmem:[#allocation13 + $0x64] sm:$0xf0]  ;;  %v2766_v22 = vld [vmem:[#allocation13 + $0xe0] sm:$0xf] }
 0x1c5   : > { %v1095_v34 = vadd.f32 %v3656_v50, %v1079_v24  ;;  %v1096_v38 = vadd.f32 %v3658_v35, %v1080_v27  ;;  %1969 = vmatpush.bf16.msrb.mxu3 %v2771_v17  ;;  %v2703_v23 = vor.u32 %v2899_v21, %v2702_v20  ;;  %v2915_v24 = vld [vmem:[#allocation13 + $0xe4] sm:$0xf0]  ;;  %v2670_v20 = vld [vmem:[#allocation13 + $0x20] sm:$0xf] }
 0x1c6   : > { %v963_v25 = vpop.f32.mrf.mxu2  ;;  %v991_v26 = vpop.f32.mrf.mxu3  ;;  %v2767_v27 = vor.u32 %v2915_v24, %v2766_v22  ;;  %v2891_v21 = vld [vmem:[#allocation13 + $0x24] sm:$0xf0]  ;;  %v2734_v22 = vld [vmem:[#allocation13 + $0xa0] sm:$0xf]  ;;  %v1611_v24 = vld [vmem:[#allocation1 + $0x9] sm:$0xff] }
 0x1c7   : > { %v992_v30 = vadd.f32 %v991_v26, %v963_v25  ;;  %v1130_v43 = vmax.f32 %v1095_v34, 0.0  ;;  %v1131_v49 = vmax.f32 %v1096_v38, 0.0  ;;  %v2896_v25 = vld [vmem:[#allocation13 + $0x54] sm:$0xf]  ;;  %v2696_v26 = vld [vmem:[#allocation13 + $0x58] sm:$0xf0]  ;;  %1885 = vmatpush.bf16.msrb.mxu0 %v2703_v23 }
 0x1c8   : > { %v2758_v38 = vld [vmem:[#allocation13 + $0xd0] sm:$0xf]  ;;  %v1610_v23 = vld [vmem:[#allocation1] sm:$0xff] }
 0x1c9   : > { %v1059_v31 = vpack.c.bf16 %v1048_v29, %v992_v30  ;;  %v1022_v32 = vpop.f32.mrf.mxu0  ;;  %v1050_v33 = vpop.f32.mrf.mxu1  ;;  %v2699_v29 = vor.u32 %v2896_v25, %v2696_v26  ;;  %v2912_v30 = vld [vmem:[#allocation13 + $0xd4] sm:$0xf]  ;;  %v2671_v25 = vor.u32 %v2891_v21, %v2670_v20  ;;  %v2907_v26 = vld [vmem:[#allocation13 + $0xa4] sm:$0xf0] }
 0x1ca   : > { %v1051_v39 = vadd.f32 %v1050_v33, %v1022_v32 }
 0x1cb   : > { %v1081_v36 = vunpack.c.l.bf16 %v1059_v31  ;;  %v1082_v37 = vunpack.c.h.bf16 %v1059_v31  ;;  %v2760_v31 = vld [vmem:[#allocation13 + $0xd8] sm:$0xf0] }
 0x1cc   : > { %v2763_v32 = vor.u32 %v2912_v30, %v2760_v31  ;;  %v2888_v30 = vld [vmem:[#allocation13 + $0x14] sm:$0xf]  ;;  %v2664_v31 = vld [vmem:[#allocation13 + $0x18] sm:$0xf0] }
 0x1cd   : > { %v1097_v40 = vadd.f32 %v3656_v50, %v1081_v36  ;;  %v1098_v41 = vadd.f32 %v3658_v35, %v1082_v37  ;;  %v2694_v36 = vld [vmem:[#allocation13 + $0x50] sm:$0xf]  ;;  %v2897_v37 = vld [vmem:[#allocation13 + $0x54] sm:$0xf0] }
 0x1ce   : > { %v966_v44 = vpop.f32.mrf.mxu2  ;;  %v994_v47 = vpop.f32.mrf.mxu3  ;;  %1970 = vmatpush.bf16.msrb.mxu3 %v2763_v32  ;;  %v2667_v32 = vor.u32 %v2888_v30, %v2664_v31 }
 0x1cf   : > { %v1132_v48 = vmax.f32 %v1097_v40, 0.0  ;;  %v1133_v51 = vmax.f32 %v1098_v41, 0.0  ;;  %v995_v53 = vadd.f32 %v994_v47, %v966_v44  ;;  %v2913_v40 = vld [vmem:[#allocation13 + $0xd4] sm:$0xf0]  ;;  %v2894_v41 = vld [vmem:[#allocation13 + $0x44] sm:$0xf] }
 0x1d0   : > { %v2759_v44 = vor.u32 %v2913_v40, %v2758_v38  ;;  %v2889_v40 = vld [vmem:[#allocation13 + $0x14] sm:$0xf0] }
 0x1d1   : > { %v1140_v52 = vpack.c.bf16 %v1132_v48, %v1130_v43  ;;  %v1141_v54 = vpack.c.bf16 %v1133_v51, %v1131_v49  ;;  %v1060_v55 = vpack.c.bf16 %v1051_v39, %v995_v53  ;;  %v1024_v56 = vpop.f32.mrf.mxu0  ;;  %v1052_v28 = vpop.f32.mrf.mxu1  ;;  %v2695_v39 = vor.u32 %v2897_v37, %v2694_v36  ;;  %v2688_v43 = vld [vmem:[#allocation13 + $0x48] sm:$0xf0]  ;;  %v2910_v48 = vld [vmem:[#allocation13 + $0xc4] sm:$0xf]  ;;  %v2904_v36 = vld [vmem:[#allocation13 + $0x94] sm:$0xf] }
 0x1d2   : > { %v2691_v47 = vor.u32 %v2894_v41, %v2688_v43  ;;  %v2752_v49 = vld [vmem:[#allocation13 + $0xc8] sm:$0xf0]  ;;  %v2750_v56 = vld [vmem:[#allocation13 + $0xc0] sm:$0xf]  ;;  %v2728_v37 = vld [vmem:[#allocation13 + $0x98] sm:$0xf0] }
 0x1d3   : > { %1507 = vmatmul.bf16.gmra.mxu0 %v1140_v52  ;;  %1535 = vmatmul.bf16.gmra.mxu1 %v1141_v54  ;;  %v1083_v57 = vunpack.c.l.bf16 %v1060_v55  ;;  %v1084_v58 = vunpack.c.h.bf16 %v1060_v55  ;;  %v2755_v51 = vor.u32 %v2910_v48, %v2752_v49  ;;  %v2895_v55 = vld [vmem:[#allocation13 + $0x44] sm:$0xf0]  ;;  %v2731_v38 = vor.u32 %v2904_v36, %v2728_v37  ;;  %v2726_v41 = vld [vmem:[#allocation13 + $0x90] sm:$0xf]  ;;  %v2886_v48 = vld [vmem:[#allocation13 + $0x4] sm:$0xf] }
 0x1d4   : > { %1563 = vmatmul.bf16.gmra.mxu2 %v1140_v52  ;;  %1591 = vmatmul.bf16.gmra.mxu3 %v1141_v54  ;;  %v2686_v54 = vld [vmem:[#allocation13 + $0x40] sm:$0xf]  ;;  %v2656_v49 = vld [vmem:[#allocation13 + $0x8] sm:$0xf0] }
 0x1d5   : > { %v1099_v63 = vadd.f32 %v3656_v50, %v1083_v57  ;;  %v1100_v46 = vadd.f32 %v3658_v35, %v1084_v58  ;;  %v2917_v50 = vld [vmem:[#allocation13 + $0xf4] sm:$0xf0]  ;;  %v2704_v35 = vld [vmem:[#allocation13 + $0x68] sm:$0xf0]  ;;  %1886 = vmatpush.bf16.msrb.mxu0 %v2695_v39  ;;  %1971 = vmatpush.bf16.msrb.mxu3 %v2755_v51  ;;  %v2687_v28 = vor.u32 %v2895_v55, %v2686_v54  ;;  %v2911_v57 = vld [vmem:[#allocation13 + $0xc4] sm:$0xf0] }
 0x1d6   : > { %v968_v59 = vpop.f32.mrf.mxu2  ;;  %v996_v60 = vpop.f32.mrf.mxu3  ;;  %v2775_v14 = vor.u32 %v2917_v50, %v2774_v9  ;;  %v2707_v15 = vor.u32 %v2898_v13, %v2704_v35  ;;  %v2892_v58 = vld [vmem:[#allocation13 + $0x34] sm:$0xf]  ;;  %v2742_v9 = vld [vmem:[#allocation13 + $0xb0] sm:$0xf]  ;;  %v2672_v50 = vld [vmem:[#allocation13 + $0x28] sm:$0xf0]  ;;  %v2659_v54 = vor.u32 %v2886_v48, %v2656_v49 }
 0x1d7   : > { %v1134_v3 = vmax.f32 %v1099_v63, 0.0  ;;  %v1135_v4 = vmax.f32 %v1100_v46, 0.0  ;;  %v2680_v59 = vld [vmem:[#allocation13 + $0x38] sm:$0xf0]  ;;  %v2751_v60 = vor.u32 %v2911_v57, %v2750_v56  ;;  %v2747_v63 = vor.u32 %v2908_v62, %v2744_v45  ;;  %v2662_v39 = vld [vmem:[#allocation13 + $0x10] sm:$0xf] }
 0x1d8   : > { %1912 = vmatpush.bf16.msrb.mxu1 %v2775_v14  ;;  %1941 = vmatpush.bf16.msrb.mxu2 %v2707_v15  ;;  %v2683_v61 = vor.u32 %v2892_v58, %v2680_v59  ;;  %v2675_v35 = vor.u32 %v2890_v12, %v2672_v50  ;;  %v2906_v14 = vld [vmem:[#allocation13 + $0xa4] sm:$0xf]  ;;  %v2736_v15 = vld [vmem:[#allocation13 + $0xa8] sm:$0xf0]  ;;  %v2663_v43 = vor.u32 %v2889_v40, %v2662_v39  ;;  %v2654_v56 = vld [vmem:[#allocation13] sm:$0xf] }
 0x1d9   : > { %v1142_v10 = vpack.c.bf16 %v1134_v3, %v1134_v3  ;;  %v1143_v11 = vpack.c.bf16 %v1135_v4, %v1135_v4  ;;  %1887 = vmatpush.bf16.msrb.mxu0 %v2687_v28  ;;  %1972 = vmatpush.bf16.msrb.mxu3 %v2747_v63  ;;  %v2739_v17 = vor.u32 %v2906_v14, %v2736_v15  ;;  %v2902_v51 = vld [vmem:[#allocation13 + $0x84] sm:$0xf]  ;;  %v2720_v55 = vld [vmem:[#allocation13 + $0x88] sm:$0xf0]  ;;  %v2887_v28 = vld [vmem:[#allocation13 + $0x4] sm:$0xf0] }
 0x1da   : > { %v2723_v57 = vor.u32 %v2902_v51, %v2720_v55  ;;  %v2655_v58 = vor.u32 %v2887_v28, %v2654_v56  ;;  %v2718_v59 = vld [vmem:[#allocation13 + $0x80] sm:$0xf]  ;;  %v1612_v12 = vpack.i.b16 %v1610_v23, %v1610_v23 }
 0x1dc   : > { %1913 = vmatpush.bf16.msrb.mxu1 %v2767_v27  ;;  %1942 = vmatpush.bf16.msrb.mxu2 %v2699_v29  ;;  %v1723_v27 = vld [vmem:[%s3837_s9] sm:$0x3]  ;;  %v2735_v29 = vor.u32 %v2907_v26, %v2734_v22  ;;  %v1614_v15 = vperm.slane %v1612_v12, 0 }
 0x1dd   : > { %1973 = vmatpush.bf16.msrb.mxu3 %v2739_v17  ;;  %2004 = vst [vmem:[#allocation1] ss:$9 sm:$0xff] %v1723_v27 }
 0x1de   : > { %v3674_v5 = vpop.f32.mrf.mxu2  ;;  %v3676_v6 = vpop.f32.mrf.mxu3  ;;  %v3709_v26 = vunpack.c.l.bf16 %v1614_v15 }
 0x1e0   : > { %1914 = vmatpush.bf16.msrb.mxu1 %v2759_v44  ;;  %1943 = vmatpush.bf16.msrb.mxu2 %v2691_v47  ;;  %v2905_v44 = vld [vmem:[#allocation13 + $0x94] sm:$0xf0] }
 0x1e1   : > { %1974 = vmatpush.bf16.msrb.mxu3 %v2731_v38  ;;  %v2727_v47 = vor.u32 %v2905_v44, %v2726_v41 }
 0x1e3   : > { %1512 = vmatmul.bf16.gmra.mxu0 %v1142_v10  ;;  %1540 = vmatmul.bf16.gmra.mxu1 %v1143_v11 }
 0x1e4   : > { %1568 = vmatmul.bf16.gmra.mxu2 %v1142_v10  ;;  %1596 = vmatmul.bf16.gmra.mxu3 %v1143_v11  ;;  %v2679_v10 = vor.u32 %v2893_v8, %v2678_v7  ;;  %v2909_v11 = vld [vmem:[#allocation13 + $0xb4] sm:$0xf0] }
 0x1e5   : > { %1915 = vmatpush.bf16.msrb.mxu1 %v2751_v60  ;;  %1944 = vmatpush.bf16.msrb.mxu2 %v2683_v61  ;;  %v2743_v13 = vor.u32 %v2909_v11, %v2742_v9  ;;  %v2903_v60 = vld [vmem:[#allocation13 + $0x84] sm:$0xf0] }
 0x1e6   : > { %v3678_v18 = vpop.f32.mrf.mxu2  ;;  %v3680_v19 = vpop.f32.mrf.mxu3  ;;  %1888 = vmatpush.bf16.msrb.mxu0 %v2679_v10  ;;  %v2719_v61 = vor.u32 %v2903_v60, %v2718_v59  ;;  %1975 = vmatpush.bf16.msrb.mxu3 %v2723_v57 }
 0x1e9   : > { %1916 = vmatpush.bf16.msrb.mxu1 %v2743_v13  ;;  %1945 = vmatpush.bf16.msrb.mxu2 %v2675_v35  ;;  %v1615_v13 = vpack.i.b16 %v1611_v24, %v1611_v24 }
 0x1ea   : > { %1889 = vmatpush.bf16.msrb.mxu0 %v2671_v25 }
 0x1ed   : > { %1917 = vmatpush.bf16.msrb.mxu1 %v2735_v29  ;;  %1946 = vmatpush.bf16.msrb.mxu2 %v2667_v32 }
 0x1ee   : > { %v3682_v33 = vpop.f32.mrf.mxu2  ;;  %v3684_v34 = vpop.f32.mrf.mxu3  ;;  %1890 = vmatpush.bf16.msrb.mxu0 %v2663_v43 }
 0x1f1   : > { %1918 = vmatpush.bf16.msrb.mxu1 %v2727_v47  ;;  %1947 = vmatpush.bf16.msrb.mxu2 %v2659_v54 }
 0x1f2   : > { %1891 = vmatpush.bf16.msrb.mxu0 %v2655_v58 }
 0x1f5   : > { %1919 = vmatpush.bf16.msrb.mxu1 %v2719_v61 }
 0x1f6   : > { %v3686_v53 = vpop.f32.mrf.mxu2  ;;  %v3688_v52 = vpop.f32.mrf.mxu3 }
 0x1fe   : > { %v3690_v46 = vpop.f32.mrf.mxu2  ;;  %v3692_v0 = vpop.f32.mrf.mxu3 }
 0x206   : > { %v3694_v1 = vpop.f32.mrf.mxu2  ;;  %v3696_v2 = vpop.f32.mrf.mxu3 }
 0x20e   : > { %v3698_v3 = vpop.f32.mrf.mxu2  ;;  %v3700_v4 = vpop.f32.mrf.mxu3 }
 0x216   : > { %v1299_v16 = vpop.f32.mrf.mxu2  ;;  %v1327_v42 = vpop.f32.mrf.mxu3 }
 0x217   : > { %v1617_v16 = vperm.slane %v1615_v13, 0 }
 0x219   : > { %v3711_v27 = vunpack.c.l.bf16 %v1617_v16 }
 0x230   : > { %v1498_v62 = vpop.f32.mrf.mxu0  ;;  %v1526_v45 = vpop.f32.mrf.mxu1 }
 0x231   : > { %v1499_v63 = vadd.f32 %v1498_v62, %v3674_v5 }
 0x233   : > { %v1527_v35 = vadd.f32 %v1526_v45, %v1499_v63 }
 0x237   : > { %v1554_v7 = vpop.f32.mrf.mxu2  ;;  %v1582_v8 = vpop.f32.mrf.mxu3 }
 0x238   : > { %v1555_v9 = vadd.f32 %v1554_v7, %v3676_v6  ;;  %v1500_v10 = vpop.f32.mrf.mxu0  ;;  %v1528_v11 = vpop.f32.mrf.mxu1 }
 0x239   : > { %v1501_v42 = vadd.f32 %v1500_v10, %v3678_v18 }
 0x23a   : > { %v1583_v50 = vadd.f32 %v1582_v8, %v1555_v9 }
 0x23b   : > { %v1529_v23 = vadd.f32 %v1528_v11, %v1501_v42 }
 0x23c   : > { %v1601_v14 = vpack.c.bf16 %v1583_v50, %v1527_v35 }
 0x23e   : > { %v1618_v25 = vunpack.c.l.bf16 %v1601_v14  ;;  %v1619_v6 = vunpack.c.h.bf16 %v1601_v14 }
 0x23f   : > { %v1556_v17 = vpop.f32.mrf.mxu2  ;;  %v1584_v20 = vpop.f32.mrf.mxu3 }
 0x240   : > { %v1557_v21 = vadd.f32 %v1556_v17, %v3680_v19  ;;  %v1503_v5 = vpop.f32.mrf.mxu0  ;;  %v1531_v22 = vpop.f32.mrf.mxu1  ;;  %v1634_v30 = vadd.f32 %v3709_v26, %v1618_v25  ;;  %v1635_v31 = vadd.f32 %v3711_v27, %v1619_v6 }
 0x241   : > { %v1504_v36 = vadd.f32 %v1503_v5, %v3682_v33 }
 0x242   : > { %v1585_v24 = vadd.f32 %v1584_v20, %v1557_v21  ;;  %v1669_v44 = vmax.f32 %v1634_v30, 0.0  ;;  %v1670_v47 = vmax.f32 %v1635_v31, 0.0 }
 0x243   : > { %v1532_v54 = vadd.f32 %v1531_v22, %v1504_v36 }
 0x244   : > { %v1602_v29 = vpack.c.bf16 %v1585_v24, %v1529_v23 }
 0x246   : > { %v1620_v18 = vunpack.c.l.bf16 %v1602_v29  ;;  %v1621_v32 = vunpack.c.h.bf16 %v1602_v29 }
 0x247   : > { %v1559_v19 = vpop.f32.mrf.mxu2  ;;  %v1587_v37 = vpop.f32.mrf.mxu3 }
 0x248   : > { %v1636_v38 = vadd.f32 %v3709_v26, %v1620_v18  ;;  %v1637_v39 = vadd.f32 %v3711_v27, %v1621_v32  ;;  %v1560_v40 = vadd.f32 %v1559_v19, %v3684_v34  ;;  %v1505_v41 = vpop.f32.mrf.mxu0  ;;  %v1533_v43 = vpop.f32.mrf.mxu1 }
 0x249   : > { %v1506_v33 = vadd.f32 %v1505_v41, %v3686_v53 }
 0x24a   : > { %v1671_v48 = vmax.f32 %v1636_v38, 0.0  ;;  %v1672_v49 = vmax.f32 %v1637_v39, 0.0  ;;  %v1588_v51 = vadd.f32 %v1587_v37, %v1560_v40 }
 0x24b   : > { %v1534_v45 = vadd.f32 %v1533_v43, %v1506_v33 }
 0x24c   : > { %v1683_v55 = vpack.c.bf16 %v1671_v48, %v1669_v44  ;;  %v1684_v56 = vpack.c.bf16 %v1672_v49, %v1670_v47  ;;  %v1603_v28 = vpack.c.bf16 %v1588_v51, %v1532_v54 }
 0x24e   : > { %1892 = vmatmul.bf16.vlgmr.msrb.gmra.mxu0 %v1683_v55  ;;  %1920 = vmatmul.bf16.vlgmr.msrb.gmra.mxu1 %v1684_v56  ;;  %v1622_v61 = vunpack.c.l.bf16 %v1603_v28  ;;  %v1623_v62 = vunpack.c.h.bf16 %v1603_v28 }
 0x24f   : > { %1948 = vmatmul.bf16.vlgmr.msrb.gmra.mxu2 %v1683_v55  ;;  %1976 = vmatmul.bf16.vlgmr.msrb.gmra.mxu3 %v1684_v56  ;;  %v1561_v57 = vpop.f32.mrf.mxu2  ;;  %v1589_v58 = vpop.f32.mrf.mxu3 }
 0x250   : > { %v1562_v34 = vadd.f32 %v1561_v57, %v3688_v52  ;;  %v1508_v59 = vpop.f32.mrf.mxu0  ;;  %v1536_v60 = vpop.f32.mrf.mxu1  ;;  %v1638_v8 = vadd.f32 %v3709_v26, %v1622_v61  ;;  %v1639_v53 = vadd.f32 %v3711_v27, %v1623_v62 }
 0x251   : > { %v1509_v11 = vadd.f32 %v1508_v59, %v3690_v46 }
 0x252   : > { %v1590_v63 = vadd.f32 %v1589_v58, %v1562_v34  ;;  %v1673_v16 = vmax.f32 %v1638_v8, 0.0  ;;  %v1674_v20 = vmax.f32 %v1639_v53, 0.0 }
 0x253   : > { %v1537_v5 = vadd.f32 %v1536_v60, %v1509_v11 }
 0x254   : > { %v1604_v7 = vpack.c.bf16 %v1590_v63, %v1534_v45 }
 0x256   : > { %v1624_v9 = vunpack.c.l.bf16 %v1604_v7  ;;  %v1625_v10 = vunpack.c.h.bf16 %v1604_v7 }
 0x257   : > { %v1564_v12 = vpop.f32.mrf.mxu2  ;;  %v1592_v50 = vpop.f32.mrf.mxu3 }
 0x258   : > { %v1565_v13 = vadd.f32 %v1564_v12, %v3692_v0  ;;  %v1510_v52 = vpop.f32.mrf.mxu0  ;;  %v1538_v35 = vpop.f32.mrf.mxu1  ;;  %v1640_v14 = vadd.f32 %v3709_v26, %v1624_v9  ;;  %v1641_v15 = vadd.f32 %v3711_v27, %v1625_v10  ;;  %v2005_v9 = vld [vmem:[#allocation1] sm:$0xff]  ;;  %v2006_v10 = vld [vmem:[#allocation1 + $0x9] sm:$0xff] }
 0x259   : > { %v1511_v46 = vadd.f32 %v1510_v52, %v3694_v1  ;;  %v2007_v12 = vpack.i.b16 %v2005_v9, %v2005_v9 }
 0x25a   : > { %v1593_v42 = vadd.f32 %v1592_v50, %v1565_v13  ;;  %v1675_v17 = vmax.f32 %v1640_v14, 0.0  ;;  %v1676_v21 = vmax.f32 %v1641_v15, 0.0  ;;  %v2010_v50 = vpack.i.b16 %v2006_v10, %v2006_v10 }
 0x25b   : > { %v1539_v32 = vadd.f32 %v1538_v35, %v1511_v46  ;;  %v2009_v13 = vperm.slane %v2007_v12, 0 }
 0x25c   : > { %v1685_v22 = vpack.c.bf16 %v1675_v17, %v1673_v16  ;;  %v1686_v25 = vpack.c.bf16 %v1676_v21, %v1674_v20  ;;  %v1605_v6 = vpack.c.bf16 %v1593_v42, %v1537_v5  ;;  %v2012_v52 = vperm.slane %v2010_v50, 0 }
 0x25d   : > { %v3737_v17 = vunpack.c.l.bf16 %v2009_v13 }
 0x25e   : > { %1897 = vmatmul.bf16.gmra.mxu0 %v1685_v22  ;;  %1925 = vmatmul.bf16.gmra.mxu1 %v1686_v25  ;;  %v1626_v31 = vunpack.c.l.bf16 %v1605_v6  ;;  %v1627_v18 = vunpack.c.h.bf16 %v1605_v6  ;;  %v3739_v20 = vunpack.c.l.bf16 %v2012_v52 }
 0x25f   : > { %1953 = vmatmul.bf16.gmra.mxu2 %v1685_v22  ;;  %1981 = vmatmul.bf16.gmra.mxu3 %v1686_v25  ;;  %v1566_v0 = vpop.f32.mrf.mxu2  ;;  %v1594_v23 = vpop.f32.mrf.mxu3 }
 0x260   : > { %v1567_v24 = vadd.f32 %v1566_v0, %v3696_v2  ;;  %v1513_v29 = vpop.f32.mrf.mxu0  ;;  %v1541_v30 = vpop.f32.mrf.mxu1  ;;  %v1642_v37 = vadd.f32 %v3709_v26, %v1626_v31  ;;  %v1643_v38 = vadd.f32 %v3711_v27, %v1627_v18 }
 0x261   : > { %v1514_v40 = vadd.f32 %v1513_v29, %v3698_v3 }
 0x262   : > { %v1595_v36 = vadd.f32 %v1594_v23, %v1567_v24  ;;  %v1677_v51 = vmax.f32 %v1642_v37, 0.0  ;;  %v1678_v54 = vmax.f32 %v1643_v38, 0.0 }
 0x263   : > { %v1542_v55 = vadd.f32 %v1541_v30, %v1514_v40 }
 0x264   : > { %v1606_v19 = vpack.c.bf16 %v1595_v36, %v1539_v32 }
 0x266   : > { %v1628_v1 = vunpack.c.l.bf16 %v1606_v19  ;;  %v1629_v39 = vunpack.c.h.bf16 %v1606_v19 }
 0x267   : > { %v1569_v41 = vpop.f32.mrf.mxu2  ;;  %v1597_v43 = vpop.f32.mrf.mxu3 }
 0x268   : > { %v1570_v44 = vadd.f32 %v1569_v41, %v3700_v4  ;;  %v1515_v2 = vpop.f32.mrf.mxu0  ;;  %v1543_v47 = vpop.f32.mrf.mxu1  ;;  %v1644_v48 = vadd.f32 %v3709_v26, %v1628_v1  ;;  %v1645_v49 = vadd.f32 %v3711_v27, %v1629_v39 }
 0x26a   : > { %v1598_v56 = vadd.f32 %v1597_v43, %v1570_v44  ;;  %v1679_v28 = vmax.f32 %v1644_v48, 0.0  ;;  %v1680_v33 = vmax.f32 %v1645_v49, 0.0 }
 0x26c   : > { %v1607_v57 = vpack.c.bf16 %v1598_v56, %v1542_v55  ;;  %v1687_v58 = vpack.c.bf16 %v1679_v28, %v1677_v51  ;;  %v1688_v34 = vpack.c.bf16 %v1680_v33, %v1678_v54 }
 0x26e   : > { %1902 = vmatmul.bf16.gmra.mxu0 %v1687_v58  ;;  %1930 = vmatmul.bf16.gmra.mxu1 %v1688_v34  ;;  %v1630_v59 = vunpack.c.l.bf16 %v1607_v57  ;;  %v1631_v60 = vunpack.c.h.bf16 %v1607_v57 }
 0x26f   : > { %1958 = vmatmul.bf16.gmra.mxu2 %v1687_v58  ;;  %1986 = vmatmul.bf16.gmra.mxu3 %v1688_v34  ;;  %v1571_v3 = vpop.f32.mrf.mxu2  ;;  %v1599_v4 = vpop.f32.mrf.mxu3 }
 0x270   : > { %v1646_v61 = vadd.f32 %v3709_v26, %v1630_v59  ;;  %v1647_v62 = vadd.f32 %v3711_v27, %v1631_v60 }
 0x272   : > { %v1681_v45 = vmax.f32 %v1646_v61, 0.0  ;;  %v1682_v63 = vmax.f32 %v1647_v62, 0.0 }
 0x274   : > { %v1689_v7 = vpack.c.bf16 %v1681_v45, %v1681_v45  ;;  %v1690_v8 = vpack.c.bf16 %v1682_v63, %v1682_v63 }
 0x27e   : > { %1907 = vmatmul.bf16.gmra.mxu0 %v1689_v7  ;;  %1935 = vmatmul.bf16.gmra.mxu1 %v1690_v8 }
 0x27f   : > { %1963 = vmatmul.bf16.gmra.mxu2 %v1689_v7  ;;  %1991 = vmatmul.bf16.gmra.mxu3 %v1690_v8 }
 0x2cb   : > { %v1893_v53 = vpop.f32.mrf.mxu0  ;;  %v1921_v11 = vpop.f32.mrf.mxu1 }
 0x2cc   : > { %v1922_v14 = vadd.f32 %v1921_v11, %v1893_v53 }
 0x2d2   : > { %v1949_v35 = vpop.f32.mrf.mxu2  ;;  %v1977_v26 = vpop.f32.mrf.mxu3 }
 0x2d3   : > { %v1978_v27 = vadd.f32 %v1977_v26, %v1949_v35  ;;  %v1895_v15 = vpop.f32.mrf.mxu0  ;;  %v1923_v16 = vpop.f32.mrf.mxu1 }
 0x2d4   : > { %v1924_v24 = vadd.f32 %v1923_v16, %v1895_v15 }
 0x2d5   : > { %v1996_v42 = vpack.c.bf16 %v1978_v27, %v1922_v14 }
 0x2d7   : > { %v2013_v21 = vunpack.c.l.bf16 %v1996_v42  ;;  %v2014_v5 = vunpack.c.h.bf16 %v1996_v42 }
 0x2d9   : > { %v2029_v22 = vadd.f32 %v3737_v17, %v2013_v21  ;;  %v2030_v25 = vadd.f32 %v3739_v20, %v2014_v5 }
 0x2da   : > { %v1951_v6 = vpop.f32.mrf.mxu2  ;;  %v1979_v46 = vpop.f32.mrf.mxu3 }
 0x2db   : > { %v2064_v0 = vmax.f32 %v2029_v22, 0.0  ;;  %v2065_v23 = vmax.f32 %v2030_v25, 0.0  ;;  %v1980_v29 = vadd.f32 %v1979_v46, %v1951_v6  ;;  %v1898_v30 = vpop.f32.mrf.mxu0  ;;  %v1926_v31 = vpop.f32.mrf.mxu1 }
 0x2dc   : > { %v1927_v43 = vadd.f32 %v1926_v31, %v1898_v30 }
 0x2dd   : > { %v2078_v18 = vpack.c.bf16 %v2065_v23, %v2064_v0  ;;  %v1997_v32 = vpack.c.bf16 %v1980_v29, %v1924_v24 }
 0x2df   : > { %2085 = vst [vmem:[%s3745_s10] sm:$0xff] %v2078_v18  ;;  %v2015_v36 = vunpack.c.l.bf16 %v1997_v32  ;;  %v2016_v19 = vunpack.c.h.bf16 %v1997_v32 }
 0x2e1   : > { %v2031_v37 = vadd.f32 %v3737_v17, %v2015_v36  ;;  %v2032_v38 = vadd.f32 %v3739_v20, %v2016_v19 }
 0x2e2   : > { %v1954_v1 = vpop.f32.mrf.mxu2  ;;  %v1982_v39 = vpop.f32.mrf.mxu3 }
 0x2e3   : > { %v2066_v40 = vmax.f32 %v2031_v37, 0.0  ;;  %v2067_v41 = vmax.f32 %v2032_v38, 0.0  ;;  %v1983_v44 = vadd.f32 %v1982_v39, %v1954_v1  ;;  %v1900_v2 = vpop.f32.mrf.mxu0  ;;  %v1928_v47 = vpop.f32.mrf.mxu1 }
 0x2e4   : > { %v1929_v34 = vadd.f32 %v1928_v47, %v1900_v2 }
 0x2e5   : > { %v2079_v48 = vpack.c.bf16 %v2067_v41, %v2066_v40  ;;  %v1998_v49 = vpack.c.bf16 %v1983_v44, %v1927_v43 }
 0x2e7   : > { %2086 = vst [vmem:[%s3745_s10 + $0x8] sm:$0xff] %v2079_v48  ;;  %v2017_v51 = vunpack.c.l.bf16 %v1998_v49  ;;  %v2018_v54 = vunpack.c.h.bf16 %v1998_v49 }
 0x2e9   : > { %v2033_v55 = vadd.f32 %v3737_v17, %v2017_v51  ;;  %v2034_v56 = vadd.f32 %v3739_v20, %v2018_v54 }
 0x2ea   : > { %v1956_v28 = vpop.f32.mrf.mxu2  ;;  %v1984_v33 = vpop.f32.mrf.mxu3 }
 0x2eb   : > { %v2068_v57 = vmax.f32 %v2033_v55, 0.0  ;;  %v2069_v58 = vmax.f32 %v2034_v56, 0.0  ;;  %v1985_v3 = vadd.f32 %v1984_v33, %v1956_v28  ;;  %v1903_v4 = vpop.f32.mrf.mxu0  ;;  %v1931_v59 = vpop.f32.mrf.mxu1 }
 0x2ec   : > { %v1932_v11 = vadd.f32 %v1931_v59, %v1903_v4 }
 0x2ed   : > { %v2080_v60 = vpack.c.bf16 %v2069_v58, %v2068_v57  ;;  %v1999_v61 = vpack.c.bf16 %v1985_v3, %v1929_v34 }
 0x2ef   : > { %2087 = vst [vmem:[%s3745_s10 + $0x10] sm:$0xff] %v2080_v60  ;;  %v2019_v62 = vunpack.c.l.bf16 %v1999_v61  ;;  %v2020_v45 = vunpack.c.h.bf16 %v1999_v61 }
 0x2f1   : > { %v2035_v63 = vadd.f32 %v3737_v17, %v2019_v62  ;;  %v2036_v7 = vadd.f32 %v3739_v20, %v2020_v45 }
 0x2f2   : > { %v1959_v8 = vpop.f32.mrf.mxu2  ;;  %v1987_v9 = vpop.f32.mrf.mxu3 }
 0x2f3   : > { %v2070_v10 = vmax.f32 %v2035_v63, 0.0  ;;  %v2071_v53 = vmax.f32 %v2036_v7, 0.0  ;;  %v1988_v12 = vadd.f32 %v1987_v9, %v1959_v8  ;;  %v1905_v50 = vpop.f32.mrf.mxu0  ;;  %v1933_v13 = vpop.f32.mrf.mxu1 }
 0x2f4   : > { %v1934_v22 = vadd.f32 %v1933_v13, %v1905_v50 }
 0x2f5   : > { %v2081_v52 = vpack.c.bf16 %v2071_v53, %v2070_v10  ;;  %v2000_v35 = vpack.c.bf16 %v1988_v12, %v1932_v11 }
 0x2f7   : > { %2088 = vst [vmem:[%s3745_s10 + $0x18] sm:$0xff] %v2081_v52  ;;  %v2021_v26 = vunpack.c.l.bf16 %v2000_v35  ;;  %v2022_v14 = vunpack.c.h.bf16 %v2000_v35 }
 0x2f9   : > { %v2037_v27 = vadd.f32 %v3737_v17, %v2021_v26  ;;  %v2038_v15 = vadd.f32 %v3739_v20, %v2022_v14 }
 0x2fa   : > { %v1961_v16 = vpop.f32.mrf.mxu2  ;;  %v1989_v42 = vpop.f32.mrf.mxu3 }
 0x2fb   : > { %v2072_v21 = vmax.f32 %v2037_v27, 0.0  ;;  %v2073_v5 = vmax.f32 %v2038_v15, 0.0  ;;  %v1990_v25 = vadd.f32 %v1989_v42, %v1961_v16  ;;  %v1908_v6 = vpop.f32.mrf.mxu0  ;;  %v1936_v46 = vpop.f32.mrf.mxu1 }
 0x2fc   : > { %v1937_v37 = vadd.f32 %v1936_v46, %v1908_v6 }
 0x2fd   : > { %v2082_v0 = vpack.c.bf16 %v2073_v5, %v2072_v21  ;;  %v2001_v23 = vpack.c.bf16 %v1990_v25, %v1934_v22 }
 0x2ff   : > { %2089 = vst [vmem:[%s3745_s10 + $0x20] sm:$0xff] %v2082_v0  ;;  %v2023_v24 = vunpack.c.l.bf16 %v2001_v23  ;;  %v2024_v29 = vunpack.c.h.bf16 %v2001_v23 }
 0x301   : > { %v2039_v30 = vadd.f32 %v3737_v17, %v2023_v24  ;;  %v2040_v31 = vadd.f32 %v3739_v20, %v2024_v29 }
 0x302   : > { %v1964_v18 = vpop.f32.mrf.mxu2  ;;  %v1992_v32 = vpop.f32.mrf.mxu3 }
 0x303   : > { %v2074_v36 = vmax.f32 %v2039_v30, 0.0  ;;  %v2075_v19 = vmax.f32 %v2040_v31, 0.0  ;;  %v1993_v38 = vadd.f32 %v1992_v32, %v1964_v18  ;;  %v1910_v1 = vpop.f32.mrf.mxu0  ;;  %v1938_v39 = vpop.f32.mrf.mxu1 }
 0x305   : > { %v2083_v40 = vpack.c.bf16 %v2075_v19, %v2074_v36  ;;  %v2002_v41 = vpack.c.bf16 %v1993_v38, %v1937_v37 }
 0x307   : > { %2090 = vst [vmem:[%s3745_s10 + $0x28] sm:$0xff] %v2083_v40  ;;  %v2025_v43 = vunpack.c.l.bf16 %v2002_v41  ;;  %v2026_v44 = vunpack.c.h.bf16 %v2002_v41 }
 0x309   : > { %v2041_v2 = vadd.f32 %v3737_v17, %v2025_v43  ;;  %v2042_v47 = vadd.f32 %v3739_v20, %v2026_v44 }
 0x30a   : > { %v1966_v48 = vpop.f32.mrf.mxu2  ;;  %v1994_v49 = vpop.f32.mrf.mxu3 }
 0x30b   : > { %v2076_v51 = vmax.f32 %v2041_v2, 0.0  ;;  %v2077_v54 = vmax.f32 %v2042_v47, 0.0  ;;  %2099 = sbr.rel (!%p3461_p11) target bundleno = 815 (0x32f), region = 92 }
 0x30d   : > { %v2084_v55 = vpack.c.bf16 %v2077_v54, %v2076_v51 }
 0x30f   : > { %2091 = vst [vmem:[%s3745_s10 + $0x30] sm:$0xff] %v2084_v55 }
 0x310   : > { %s3882_s11 = smov (!%p2102_p6, %s2101_s11), 7 }
 0x311   : > { %s2918_s20 = sshll.u32 %s3882_s11, 3 }
 0x312   : > { %s2106_s19 = ssub.s32 56, %s2918_s20 }
 0x313   : > { %s2107_s18 = sshll.u32 %s2106_s19, 4 }
 0x314   : > { %2108 = vsyncadd %s2093_s21, %s2107_s18  ;;  %p3775_p1 = scmp.ne.s32.totalorder %s2918_s20, 0  ;;  %s2921_s30 = smul.u32 56, %s3430_s17 }
 0x315   : > { %s2114_s26 = sshll.u32 %s3745_s10, 4  ;;  %s2786_s13 = sshll.u32 %s3882_s11, 7  ;;  %s3785_s26 = int_to_ptr.vmem [resolvable:$true] %s2114_s26 }
 0x316   : > { %s3870_s24 = sld [smem:[#allocation27_spill]]  ;;  %s3249_s2 = sshra.s32 %s3785_s26, 4  ;;  %s3250_s2 = int_to_ptr.vmem [resolvable:$true] %s3249_s2 }
 0x317   : > { %s3251_s23 = sshrl.u32 %s2786_s13, 4  ;;  %s3351_s17 = smov [#allocation14]  }
 0x318   : > { %s3256_s3 = scalar_lea.vmem %s3250_s2, %s3251_s23  ;;  %s3260_s10 = scalar_lea.vmem %s3351_s17, 112 }
 0x319   : > { %p3257_p11 = scmp.ne.s32.totalorder %s3250_s2, %s3256_s3  ;;  %p3262_p3 = scmp.lt.s32.totalorder %s3260_s10, %s3256_s3 }
 0x31b   : > { %p3258_p0 = pnand %p3257_p11, %p3775_p1 }
 0x31c   : > { %s2112_s27 = scalar_lea.hbm %s3870_s24, %s2921_s30 }
 0x31d   : > { %s2116_s12 = sshll.u32 %s2112_s27, 4  ;;  %p3259_p2 = pneg %p3258_p0  ;;  %s3787_s12 = int_to_ptr.hbm [resolvable:$true] %s2116_s12 }
 0x31f   : > { %p3264_p7 = pnand %p3262_p3, %p3259_p2 }
 0x321   : > { %3267 = shalt.err (!%p3264_p7)
}
 0x322   : > { %s3268_s29 = sshra.s32 %s3787_s12, 4  ;;  %s3279_s30 = scalar_lea.hbm %s3870_s24, 256  ;;  %s3269_s29 = int_to_ptr.hbm [resolvable:$true] %s3268_s29 }
 0x323   : > { %s3275_s20 = scalar_lea.hbm %s3269_s29, %s3251_s23  ;;  %p3280_p13 = scmp.lt.s32.totalorder %s3269_s29, %s3870_s24 }
 0x324   : > { %p3276_p8 = scmp.ne.s32.totalorder %s3269_s29, %s3275_s20  ;;  %p3281_p5 = scmp.lt.s32.totalorder %s3279_s30, %s3275_s20 }
 0x326   : > { %p3277_p4 = pnand %p3276_p8, %p3775_p1  ;;  %p3282_p9 = por %p3281_p5, %p3280_p13 }
 0x328   : > { %p3278_p12 = pneg %p3277_p4 }
 0x32a   : > { %p3283_p10 = pnand %p3282_p9, %p3278_p12 }
 0x32c   : > { %3286 = shalt.err (!%p3283_p10)
}
 0x32d   : > { %s3352_s27 = smov 128   ;;  %s3353_s2 = smov 8  }
 0x32e   : > { %2122 = dma.vmem_to_hbm [thread:$0]  (%p3775_p1), %s3785_s26, %s2786_s13, %s3787_s12, %s2093_s21, %s3352_s27, %s3352_s27, %s3353_s2  }
 0x32f PF: > { %s3871_s23 = sld [smem:[#allocation20_spill]]  ;;  %p2985_p6 = scmp.ge.s32.totalorder %s3338_s16, 2 }
 0x330   : > { %s3872_s3 = sld [smem:[#allocation23_spill]] }
 0x335   : > { %s2131_s17 = sand.u32 1, %s3871_s23  }
 0x336   : > { %p3873_p11 = scmp.ne.s32.totalorder %s3872_s3, 0  ;;  %s2132_s10 = scalar_lea.sflag [#allocation4], %s2131_s17 }
 0x338   : > { %p2970_p0 = pnand %p2985_p6, %p3873_p11 }
 0x33a   : > { %p2971_p2 = pneg %p2970_p0 }
 0x33c   : > { %3321 = dma.done.wait (%p2971_p2), %s2132_s10, 896  }
 0x33d   : > { %3323 = vsyncadd (%p2971_p2), %s2132_s10, 4294966400  ;;  %s3874_s16 = sld [smem:[#allocation21_spill]]  ;;  %s3876_s13 = smov %s3330_s14 }
 0x33e   : > { %s3875_s25 = sld [smem:[#allocation22_spill]]  ;;  %s3877_s14 = smov %s3334_s15 }
 0x343   : > { %p26_p3 = scmp.ge.s32.totalorder %s3874_s16, 7  }
 0x344   : > { %s3878_s15 = smov %s3875_s25 }
 0x345   :  { %28 = sbr.rel (!%p26_p3) target bundleno = 13 (0xd), region = 129 }
 0x34a   :  { %2138 = vsyncpa [#allocation3], 1 }
 0x34b   :  { %2140 = vsyncpa [#allocation3 + $0x1], 1 }
 0x34c   :  { %2141 = vsyncpa [#allocation6], 1 }
 0x34d   :  { %2142 = vsyncpa [#allocation9], 1 }
 0x34e   :  { %2143 = vsyncpa [#allocation12], 1 }
 0x34f   :  { %2144 = vsyncpa [#allocation4], 1 }
 0x350   :  { %2146 = vsyncpa [#allocation4 + $0x1], 1 }

</bundles_post_ra>
